<compile_context>
chip_gen: v5e
topology: v5e:2x2
jax: 0.10.0
libtpu: 0.0.40
codegen_flags: <defaults>
</compile_context>

<pallas_src>
import jax
import jax.numpy as jnp
from jax import lax
from jax.experimental import pallas as pl
from jax.experimental.pallas import tpu as pltpu

EPS = 1e-5  # PyTorch InstanceNorm2d default (affine=False, biased variance)

# Sub-pixel decomposition of ConvTranspose2d(k=4, s=2, p=1):
# output pixel (2a+dy, 2b+dx) = sum over 2x2 taps (r, c) of
#   weight[:, :, KTAP[dy][r], KTAP[dx][c]] applied at input (a + OFF[dy][r], b + OFF[dx][c]).
_OFF = ((-1, 0), (0, 1))   # input offsets per output parity
_KTAP = ((3, 1), (2, 0))   # matching ConvTranspose kernel taps


def _round_up(v, m):
    return -(-v // m) * m


def _make_kernel(H, W, Wp, Lout):
    """Kernel closure over static spatial sizes.

    x_ref : (Cin, Lx)          bf16  zero-padded, flattened input (lane stride Wp)
    w_ref : (4, 4, TCo, Cin)   bf16  per-(phase, tap) weight matrices
    m_ref : (1, Lout)          f32   1.0 on valid output lanes, 0.0 on padded lanes
    o_ref : (4, TCo, Lout)           InstanceNorm + ReLU result, lane-dense
    """
    def kernel(x_ref, w_ref, m_ref, o_ref):
        # --- 4 sub-pixel phases, each = 4 shifted K=Cin matmuls, f32 accumulate ---
        ys = []
        for p in range(4):
            dy, dx = divmod(p, 2)
            acc = None
            for r in range(2):
                for c in range(2):
                    t = 2 * r + c
                    s = (1 + _OFF[dy][r]) * Wp + (1 + _OFF[dx][c])   # static lane offset
                    d = jnp.dot(w_ref[p, t], x_ref[:, s:s + Lout],
                                preferred_element_type=jnp.float32)
                    acc = d if acc is None else acc + d
            ys.append(acc)                                           # (TCo, Lout) f32

        # --- InstanceNorm2d (per channel, over all 4 phases x valid HxW) + ReLU ---
        m = m_ref[...]                                               # (1, Lout)
        inv_cnt = 1.0 / (4.0 * H * W)

        tot = None
        for yp in ys:
            sp = jnp.sum(yp * m, axis=1, keepdims=True)
            tot = sp if tot is None else tot + sp
        mean = tot * inv_cnt                                         # (TCo, 1)

        sq = None
        for yp in ys:
            dp = yp - mean
            s2 = jnp.sum(dp * dp * m, axis=1, keepdims=True)
            sq = s2 if sq is None else sq + s2
        scale = lax.rsqrt(sq * inv_cnt + EPS)                        # (TCo, 1)

        for p, yp in enumerate(ys):
            o_ref[p] = jnp.maximum((yp - mean) * scale, 0.0).astype(o_ref.dtype)

    return kernel


def _pack_weights(weight):
    """(Cin, Cout, 4, 4) ConvTranspose weight -> (4 phases, 4 taps, Cout, Cin) bf16."""
    w_t = jnp.transpose(weight, (1, 0, 2, 3))                        # (Cout, Cin, kH, kW)
    phases = []
    for dy in range(2):
        for dx in range(2):
            taps = [w_t[:, :, _KTAP[dy][r], _KTAP[dx][c]]
                    for r in range(2) for c in range(2)]             # each (Cout, Cin)
            phases.append(jnp.stack(taps, axis=0))                   # (4, Cout, Cin)
    return jnp.stack(phases, axis=0).astype(jnp.bfloat16)            # (4, 4, Cout, Cin)


def _pack_input(x, Lx):
    """Zero-pad 1-pixel halo and flatten: (N, Cin, H, W) -> (N, Cin, Lx) bf16."""
    N, Cin, H, W = x.shape
    xp = jnp.pad(x, ((0, 0), (0, 0), (1, 1), (1, 1)))
    xf = xp.reshape(N, Cin, (H + 2) * (W + 2))
    xf = jnp.pad(xf, ((0, 0), (0, 0), (0, Lx - xf.shape[-1])))
    return xf.astype(jnp.bfloat16)


def _pick_cout_tile(cout, lout, n_batch):
    """Cout tile: multiple of 8, f32 phase block (4, TCo, Lout) <= ~6 MiB (v7x-safe),
    and at least 2 grid tiles when N == 1 so both v7x TensorCores get work."""
    divisors = [d for d in range(8, cout + 1, 8) if cout % d == 0]
    if not divisors:
        return cout
    budget = 6 * 2 ** 20
    fitting = [d for d in divisors if 4 * d * lout * 4 <= budget]
    tco = max(fitting) if fitting else min(divisors)
    if n_batch == 1 and cout // tco < 2:
        halves = [d for d in divisors if cout // d >= 2 and 4 * d * lout * 4 <= budget]
        if halves:
            tco = max(halves)
    return tco


def unet_up(x, skip, weight, cout_tile=None):
    N, Cin, H, W = x.shape
    Cout = weight.shape[1]
    out_dtype = x.dtype

    Wp = W + 2                        # padded row stride of the flat layout
    HWp = H * Wp                      # flat length of the valid output rows
    Lout = _round_up(HWp, 128)        # lane-dense output length (unmasked stores)
    Lx = _round_up(2 * Wp + 2 + Lout, 128)   # covers the largest tap offset

    xf = _pack_input(x, Lx)                               # (N, Cin, Lx) bf16
    wp = _pack_weights(weight)                            # (4, 4, Cout, Cin) bf16
    lane = jnp.arange(Lout, dtype=jnp.int32)
    mask = ((lane < HWp) & ((lane % Wp) < W)).astype(jnp.float32).reshape(1, Lout)

    TCo = cout_tile if cout_tile is not None else _pick_cout_tile(Cout, Lout, N)
    assert Cout % TCo == 0 and (TCo % 8 == 0 or TCo == Cout)
    num_co = Cout // TCo

    # VMEM budget: double-buffered blocks + in-kernel f32 phase temporaries + slice copies.
    esize = jnp.dtype(out_dtype).itemsize
    x_blk = Cin * Lx * 2
    w_blk = 16 * TCo * Cin * 2
    o_blk = 4 * TCo * Lout * esize
    m_blk = Lout * 4
    temps = 4 * TCo * Lout * 4 + 2 * Cin * Lout * 2
    need = 2 * (x_blk + w_blk + o_blk + m_blk) + temps
    try:
        cap = int(getattr(pltpu.get_tpu_info(), "vmem_capacity_bytes", 64 << 20))
    except Exception:
        cap = 64 << 20                                    # conservative (v7x) fallback
    vmem_limit = int(max(need + (4 << 20), min(int(0.85 * cap), 96 << 20)))

    y = pl.pallas_call(
        _make_kernel(H, W, Wp, Lout),
        out_shape=jax.ShapeDtypeStruct((N, 4, Cout, Lout), out_dtype),
        grid_spec=pltpu.PrefetchScalarGridSpec(
            num_scalar_prefetch=0,
            grid=(num_co, N),                             # Cout tiles outer -> weights resident
            in_specs=[
                pl.BlockSpec((pl.Squeezed(), Cin, Lx), lambda co, n: (n, 0, 0)),
                pl.BlockSpec((4, 4, TCo, Cin), lambda co, n: (0, 0, co, 0)),
                pl.BlockSpec((1, Lout), lambda co, n: (0, 0)),
            ],
            out_specs=pl.BlockSpec((pl.Squeezed(), 4, TCo, Lout),
                                   lambda co, n: (n, 0, co, 0)),
        ),
        compiler_params=pltpu.CompilerParams(
            dimension_semantics=("parallel", "parallel"),
            vmem_limit_bytes=vmem_limit,
        ),
    )(xf, wp, mask)

    # Depth-to-space (interleave the 4 parity phases) + channel concat with skip.
    # TODO(synk): could save ~1 HBM pass by emitting the lane interleave in-kernel and writing
    # into a preallocated (N, 2*Cout, OH, OW) buffer via input_output_aliases; left to XLA.
    y = y[..., :HWp].reshape(N, 2, 2, Cout, H, Wp)[..., :W]   # (N, dy, dx, Cout, H, W)
    y = y.transpose(0, 3, 4, 1, 5, 2).reshape(N, Cout, 2 * H, 2 * W)
    return jnp.concatenate([y, skip], axis=1)                  # torch.cat((x, skip), dim=1)


def reference(x, skip, weight):
    # pure-JAX f32 reference of the PyTorch module (correctness check only)
    wref = jnp.flip(weight, (2, 3)).transpose(1, 0, 2, 3)      # OIHW
    y = lax.conv_general_dilated(
        x, wref, window_strides=(1, 1), padding=[(2, 2), (2, 2)],
        lhs_dilation=(2, 2), dimension_numbers=('NCHW', 'OIHW', 'NCHW'))
    mean = jnp.mean(y, axis=(2, 3), keepdims=True)
    var = jnp.mean((y - mean) ** 2, axis=(2, 3), keepdims=True)
    y = jnp.maximum((y - mean) / jnp.sqrt(var + EPS), 0.0)
    return jnp.concatenate([y, skip], axis=1)


if __name__ == "__main__":
    key = jax.random.PRNGKey(0)
    k1, k2, k3, k4, k5, k6 = jax.random.split(key, 6)
    # TODO(synk): dropout branch omitted (module default dropout=0.0 adds no layer)

    # Test 1: module-consistent small shapes (N=2), single Cout tile.
    N, Cin, Cout, H, W = 2, 4, 8, 16, 16
    x = jax.random.normal(k1, (N, Cin, H, W), jnp.float32)
    skip = jax.random.normal(k2, (N, Cout, 2 * H, 2 * W), jnp.float32)
    # ConvTranspose2d weight shape: (in_channels, out_channels, kH, kW), bias=False
    weight = jax.random.normal(k3, (Cin, Cout, 4, 4), jnp.float32) * 0.1
    out = jax.block_until_ready(jax.jit(unet_up)(x, skip, weight))
    ref = reference(x, skip, weight)
    assert out.shape == (N, 2 * Cout, 2 * H, 2 * W)
    err = float(jnp.max(jnp.abs(out - ref)))
    assert jnp.allclose(out, ref, atol=5e-2, rtol=5e-2), err

    # Test 2: N=1 exercises the Cout-tiled grid path (megacore split when batch == 1).
    N2, Cin2, Cout2, H2, W2 = 1, 8, 16, 8, 8
    x2 = jax.random.normal(k4, (N2, Cin2, H2, W2), jnp.float32)
    skip2 = jax.random.normal(k5, (N2, Cout2, 2 * H2, 2 * W2), jnp.float32)
    weight2 = jax.random.normal(k6, (Cin2, Cout2, 4, 4), jnp.float32) * 0.1
    out2 = jax.block_until_ready(jax.jit(unet_up)(x2, skip2, weight2))
    ref2 = reference(x2, skip2, weight2)
    assert out2.shape == (N2, 2 * Cout2, 2 * H2, 2 * W2)
    err2 = float(jnp.max(jnp.abs(out2 - ref2)))
    assert jnp.allclose(out2, ref2, atol=5e-2, rtol=5e-2), err2

    print("KERNEL_OK")
</pallas_src>

<mosaic_0001>
module attributes {stable_mosaic.version = 11 : i64} {
  func.func @kernel(%arg0: i32, %arg1: i32, %arg2: memref<1x4x512xbf16, #tpu.memory_space<vmem>>, %arg3: memref<4x4x8x4xbf16, #tpu.memory_space<vmem>>, %arg4: memref<1x384xf32, #tpu.memory_space<vmem>>, %arg5: memref<1x4x8x384xf32, #tpu.memory_space<vmem>>) attributes {dimension_semantics = [#tpu.dimension_semantics<parallel>, #tpu.dimension_semantics<parallel>], iteration_bounds = array<i64: 1, 2>, scalar_prefetch = 0 : i64, scratch_operands = 0 : i64, tpu.core_type = #tpu.core_type<tc>, window_params = [{transform_indices = @transform_0, window_bounds = array<i64: 1, 4, 512>}, {transform_indices = @transform_1, window_bounds = array<i64: 4, 4, 8, 4>}, {pipeline_mode = #tpu.pipeline_mode<synchronous>, transform_indices = @transform_2, window_bounds = array<i64: 1, 384>}, {transform_indices = @transform_3, window_bounds = array<i64: 1, 4, 8, 384>}]} {
    %c0 = arith.constant 0 : index
    %c0_0 = arith.constant 0 : index
    %c0_1 = arith.constant 0 : index
    %c0_2 = arith.constant 0 : index
    %0 = vector.load %arg3[%c0, %c0_0, %c0_1, %c0_2] : memref<4x4x8x4xbf16, #tpu.memory_space<vmem>>, vector<1x1x8x4xbf16>
    %1 = vector.shape_cast %0 : vector<1x1x8x4xbf16> to vector<8x4xbf16>
    %c0_3 = arith.constant 0 : index
    %c0_4 = arith.constant 0 : index
    %c0_5 = arith.constant 0 : index
    %2 = vector.load %arg2[%c0_3, %c0_4, %c0_5] : memref<1x4x512xbf16, #tpu.memory_space<vmem>>, vector<1x4x384xbf16>
    %3 = vector.shape_cast %2 : vector<1x4x384xbf16> to vector<4x384xbf16>
    %cst = arith.constant dense<0.000000e+00> : vector<8x384xf32>
    %4 = tpu.matmul %1, %3, %cst {dimension_numbers = #tpu.dot_dimension_numbers<[1], [0], [0], [1], [0, 0, 1, 1], [], []>} : vector<8x4xbf16>, vector<4x384xbf16>, vector<8x384xf32> -> vector<8x384xf32>
    %c0_6 = arith.constant 0 : index
    %c1 = arith.constant 1 : index
    %c0_7 = arith.constant 0 : index
    %c0_8 = arith.constant 0 : index
    %5 = vector.load %arg3[%c0_6, %c1, %c0_7, %c0_8] : memref<4x4x8x4xbf16, #tpu.memory_space<vmem>>, vector<1x1x8x4xbf16>
    %6 = vector.shape_cast %5 : vector<1x1x8x4xbf16> to vector<8x4xbf16>
    %c0_9 = arith.constant 0 : index
    %c0_10 = arith.constant 0 : index
    %c1_11 = arith.constant 1 : index
    %7 = vector.load %arg2[%c0_9, %c0_10, %c1_11] : memref<1x4x512xbf16, #tpu.memory_space<vmem>>, vector<1x4x384xbf16>
    %8 = vector.shape_cast %7 : vector<1x4x384xbf16> to vector<4x384xbf16>
    %cst_12 = arith.constant dense<0.000000e+00> : vector<8x384xf32>
    %9 = tpu.matmul %6, %8, %cst_12 {dimension_numbers = #tpu.dot_dimension_numbers<[1], [0], [0], [1], [0, 0, 1, 1], [], []>} : vector<8x4xbf16>, vector<4x384xbf16>, vector<8x384xf32> -> vector<8x384xf32>
    %10 = arith.addf %4, %9 : vector<8x384xf32>
    %c0_13 = arith.constant 0 : index
    %c2 = arith.constant 2 : index
    %c0_14 = arith.constant 0 : index
    %c0_15 = arith.constant 0 : index
    %11 = vector.load %arg3[%c0_13, %c2, %c0_14, %c0_15] : memref<4x4x8x4xbf16, #tpu.memory_space<vmem>>, vector<1x1x8x4xbf16>
    %12 = vector.shape_cast %11 : vector<1x1x8x4xbf16> to vector<8x4xbf16>
    %c0_16 = arith.constant 0 : index
    %c0_17 = arith.constant 0 : index
    %c18 = arith.constant 18 : index
    %13 = vector.load %arg2[%c0_16, %c0_17, %c18] : memref<1x4x512xbf16, #tpu.memory_space<vmem>>, vector<1x4x384xbf16>
    %14 = vector.shape_cast %13 : vector<1x4x384xbf16> to vector<4x384xbf16>
    %cst_18 = arith.constant dense<0.000000e+00> : vector<8x384xf32>
    %15 = tpu.matmul %12, %14, %cst_18 {dimension_numbers = #tpu.dot_dimension_numbers<[1], [0], [0], [1], [0, 0, 1, 1], [], []>} : vector<8x4xbf16>, vector<4x384xbf16>, vector<8x384xf32> -> vector<8x384xf32>
    %16 = arith.addf %10, %15 : vector<8x384xf32>
    %c0_19 = arith.constant 0 : index
    %c3 = arith.constant 3 : index
    %c0_20 = arith.constant 0 : index
    %c0_21 = arith.constant 0 : index
    %17 = vector.load %arg3[%c0_19, %c3, %c0_20, %c0_21] : memref<4x4x8x4xbf16, #tpu.memory_space<vmem>>, vector<1x1x8x4xbf16>
    %18 = vector.shape_cast %17 : vector<1x1x8x4xbf16> to vector<8x4xbf16>
    %c0_22 = arith.constant 0 : index
    %c0_23 = arith.constant 0 : index
    %c19 = arith.constant 19 : index
    %19 = vector.load %arg2[%c0_22, %c0_23, %c19] : memref<1x4x512xbf16, #tpu.memory_space<vmem>>, vector<1x4x384xbf16>
    %20 = vector.shape_cast %19 : vector<1x4x384xbf16> to vector<4x384xbf16>
    %cst_24 = arith.constant dense<0.000000e+00> : vector<8x384xf32>
    %21 = tpu.matmul %18, %20, %cst_24 {dimension_numbers = #tpu.dot_dimension_numbers<[1], [0], [0], [1], [0, 0, 1, 1], [], []>} : vector<8x4xbf16>, vector<4x384xbf16>, vector<8x384xf32> -> vector<8x384xf32>
    %22 = arith.addf %16, %21 : vector<8x384xf32>
    %c1_25 = arith.constant 1 : index
    %c0_26 = arith.constant 0 : index
    %c0_27 = arith.constant 0 : index
    %c0_28 = arith.constant 0 : index
    %23 = vector.load %arg3[%c1_25, %c0_26, %c0_27, %c0_28] : memref<4x4x8x4xbf16, #tpu.memory_space<vmem>>, vector<1x1x8x4xbf16>
    %24 = vector.shape_cast %23 : vector<1x1x8x4xbf16> to vector<8x4xbf16>
    %c0_29 = arith.constant 0 : index
    %c0_30 = arith.constant 0 : index
    %c1_31 = arith.constant 1 : index
    %25 = vector.load %arg2[%c0_29, %c0_30, %c1_31] : memref<1x4x512xbf16, #tpu.memory_space<vmem>>, vector<1x4x384xbf16>
    %26 = vector.shape_cast %25 : vector<1x4x384xbf16> to vector<4x384xbf16>
    %cst_32 = arith.constant dense<0.000000e+00> : vector<8x384xf32>
    %27 = tpu.matmul %24, %26, %cst_32 {dimension_numbers = #tpu.dot_dimension_numbers<[1], [0], [0], [1], [0, 0, 1, 1], [], []>} : vector<8x4xbf16>, vector<4x384xbf16>, vector<8x384xf32> -> vector<8x384xf32>
    %c1_33 = arith.constant 1 : index
    %c1_34 = arith.constant 1 : index
    %c0_35 = arith.constant 0 : index
    %c0_36 = arith.constant 0 : index
    %28 = vector.load %arg3[%c1_33, %c1_34, %c0_35, %c0_36] : memref<4x4x8x4xbf16, #tpu.memory_space<vmem>>, vector<1x1x8x4xbf16>
    %29 = vector.shape_cast %28 : vector<1x1x8x4xbf16> to vector<8x4xbf16>
    %c0_37 = arith.constant 0 : index
    %c0_38 = arith.constant 0 : index
    %c2_39 = arith.constant 2 : index
    %30 = vector.load %arg2[%c0_37, %c0_38, %c2_39] : memref<1x4x512xbf16, #tpu.memory_space<vmem>>, vector<1x4x384xbf16>
    %31 = vector.shape_cast %30 : vector<1x4x384xbf16> to vector<4x384xbf16>
    %cst_40 = arith.constant dense<0.000000e+00> : vector<8x384xf32>
    %32 = tpu.matmul %29, %31, %cst_40 {dimension_numbers = #tpu.dot_dimension_numbers<[1], [0], [0], [1], [0, 0, 1, 1], [], []>} : vector<8x4xbf16>, vector<4x384xbf16>, vector<8x384xf32> -> vector<8x384xf32>
    %33 = arith.addf %27, %32 : vector<8x384xf32>
    %c1_41 = arith.constant 1 : index
    %c2_42 = arith.constant 2 : index
    %c0_43 = arith.constant 0 : index
    %c0_44 = arith.constant 0 : index
    %34 = vector.load %arg3[%c1_41, %c2_42, %c0_43, %c0_44] : memref<4x4x8x4xbf16, #tpu.memory_space<vmem>>, vector<1x1x8x4xbf16>
    %35 = vector.shape_cast %34 : vector<1x1x8x4xbf16> to vector<8x4xbf16>
    %c0_45 = arith.constant 0 : index
    %c0_46 = arith.constant 0 : index
    %c19_47 = arith.constant 19 : index
    %36 = vector.load %arg2[%c0_45, %c0_46, %c19_47] : memref<1x4x512xbf16, #tpu.memory_space<vmem>>, vector<1x4x384xbf16>
    %37 = vector.shape_cast %36 : vector<1x4x384xbf16> to vector<4x384xbf16>
    %cst_48 = arith.constant dense<0.000000e+00> : vector<8x384xf32>
    %38 = tpu.matmul %35, %37, %cst_48 {dimension_numbers = #tpu.dot_dimension_numbers<[1], [0], [0], [1], [0, 0, 1, 1], [], []>} : vector<8x4xbf16>, vector<4x384xbf16>, vector<8x384xf32> -> vector<8x384xf32>
    %39 = arith.addf %33, %38 : vector<8x384xf32>
    %c1_49 = arith.constant 1 : index
    %c3_50 = arith.constant 3 : index
    %c0_51 = arith.constant 0 : index
    %c0_52 = arith.constant 0 : index
    %40 = vector.load %arg3[%c1_49, %c3_50, %c0_51, %c0_52] : memref<4x4x8x4xbf16, #tpu.memory_space<vmem>>, vector<1x1x8x4xbf16>
    %41 = vector.shape_cast %40 : vector<1x1x8x4xbf16> to vector<8x4xbf16>
    %c0_53 = arith.constant 0 : index
    %c0_54 = arith.constant 0 : index
    %c20 = arith.constant 20 : index
    %42 = vector.load %arg2[%c0_53, %c0_54, %c20] : memref<1x4x512xbf16, #tpu.memory_space<vmem>>, vector<1x4x384xbf16>
    %43 = vector.shape_cast %42 : vector<1x4x384xbf16> to vector<4x384xbf16>
    %cst_55 = arith.constant dense<0.000000e+00> : vector<8x384xf32>
    %44 = tpu.matmul %41, %43, %cst_55 {dimension_numbers = #tpu.dot_dimension_numbers<[1], [0], [0], [1], [0, 0, 1, 1], [], []>} : vector<8x4xbf16>, vector<4x384xbf16>, vector<8x384xf32> -> vector<8x384xf32>
    %45 = arith.addf %39, %44 : vector<8x384xf32>
    %c2_56 = arith.constant 2 : index
    %c0_57 = arith.constant 0 : index
    %c0_58 = arith.constant 0 : index
    %c0_59 = arith.constant 0 : index
    %46 = vector.load %arg3[%c2_56, %c0_57, %c0_58, %c0_59] : memref<4x4x8x4xbf16, #tpu.memory_space<vmem>>, vector<1x1x8x4xbf16>
    %47 = vector.shape_cast %46 : vector<1x1x8x4xbf16> to vector<8x4xbf16>
    %c0_60 = arith.constant 0 : index
    %c0_61 = arith.constant 0 : index
    %c18_62 = arith.constant 18 : index
    %48 = vector.load %arg2[%c0_60, %c0_61, %c18_62] : memref<1x4x512xbf16, #tpu.memory_space<vmem>>, vector<1x4x384xbf16>
    %49 = vector.shape_cast %48 : vector<1x4x384xbf16> to vector<4x384xbf16>
    %cst_63 = arith.constant dense<0.000000e+00> : vector<8x384xf32>
    %50 = tpu.matmul %47, %49, %cst_63 {dimension_numbers = #tpu.dot_dimension_numbers<[1], [0], [0], [1], [0, 0, 1, 1], [], []>} : vector<8x4xbf16>, vector<4x384xbf16>, vector<8x384xf32> -> vector<8x384xf32>
    %c2_64 = arith.constant 2 : index
    %c1_65 = arith.constant 1 : index
    %c0_66 = arith.constant 0 : index
    %c0_67 = arith.constant 0 : index
    %51 = vector.load %arg3[%c2_64, %c1_65, %c0_66, %c0_67] : memref<4x4x8x4xbf16, #tpu.memory_space<vmem>>, vector<1x1x8x4xbf16>
    %52 = vector.shape_cast %51 : vector<1x1x8x4xbf16> to vector<8x4xbf16>
    %c0_68 = arith.constant 0 : index
    %c0_69 = arith.constant 0 : index
    %c19_70 = arith.constant 19 : index
    %53 = vector.load %arg2[%c0_68, %c0_69, %c19_70] : memref<1x4x512xbf16, #tpu.memory_space<vmem>>, vector<1x4x384xbf16>
    %54 = vector.shape_cast %53 : vector<1x4x384xbf16> to vector<4x384xbf16>
    %cst_71 = arith.constant dense<0.000000e+00> : vector<8x384xf32>
    %55 = tpu.matmul %52, %54, %cst_71 {dimension_numbers = #tpu.dot_dimension_numbers<[1], [0], [0], [1], [0, 0, 1, 1], [], []>} : vector<8x4xbf16>, vector<4x384xbf16>, vector<8x384xf32> -> vector<8x384xf32>
    %56 = arith.addf %50, %55 : vector<8x384xf32>
    %c2_72 = arith.constant 2 : index
    %c2_73 = arith.constant 2 : index
    %c0_74 = arith.constant 0 : index
    %c0_75 = arith.constant 0 : index
    %57 = vector.load %arg3[%c2_72, %c2_73, %c0_74, %c0_75] : memref<4x4x8x4xbf16, #tpu.memory_space<vmem>>, vector<1x1x8x4xbf16>
    %58 = vector.shape_cast %57 : vector<1x1x8x4xbf16> to vector<8x4xbf16>
    %c0_76 = arith.constant 0 : index
    %c0_77 = arith.constant 0 : index
    %c36 = arith.constant 36 : index
    %59 = vector.load %arg2[%c0_76, %c0_77, %c36] : memref<1x4x512xbf16, #tpu.memory_space<vmem>>, vector<1x4x384xbf16>
    %60 = vector.shape_cast %59 : vector<1x4x384xbf16> to vector<4x384xbf16>
    %cst_78 = arith.constant dense<0.000000e+00> : vector<8x384xf32>
    %61 = tpu.matmul %58, %60, %cst_78 {dimension_numbers = #tpu.dot_dimension_numbers<[1], [0], [0], [1], [0, 0, 1, 1], [], []>} : vector<8x4xbf16>, vector<4x384xbf16>, vector<8x384xf32> -> vector<8x384xf32>
    %62 = arith.addf %56, %61 : vector<8x384xf32>
    %c2_79 = arith.constant 2 : index
    %c3_80 = arith.constant 3 : index
    %c0_81 = arith.constant 0 : index
    %c0_82 = arith.constant 0 : index
    %63 = vector.load %arg3[%c2_79, %c3_80, %c0_81, %c0_82] : memref<4x4x8x4xbf16, #tpu.memory_space<vmem>>, vector<1x1x8x4xbf16>
    %64 = vector.shape_cast %63 : vector<1x1x8x4xbf16> to vector<8x4xbf16>
    %c0_83 = arith.constant 0 : index
    %c0_84 = arith.constant 0 : index
    %c37 = arith.constant 37 : index
    %65 = vector.load %arg2[%c0_83, %c0_84, %c37] : memref<1x4x512xbf16, #tpu.memory_space<vmem>>, vector<1x4x384xbf16>
    %66 = vector.shape_cast %65 : vector<1x4x384xbf16> to vector<4x384xbf16>
    %cst_85 = arith.constant dense<0.000000e+00> : vector<8x384xf32>
    %67 = tpu.matmul %64, %66, %cst_85 {dimension_numbers = #tpu.dot_dimension_numbers<[1], [0], [0], [1], [0, 0, 1, 1], [], []>} : vector<8x4xbf16>, vector<4x384xbf16>, vector<8x384xf32> -> vector<8x384xf32>
    %68 = arith.addf %62, %67 : vector<8x384xf32>
    %c3_86 = arith.constant 3 : index
    %c0_87 = arith.constant 0 : index
    %c0_88 = arith.constant 0 : index
    %c0_89 = arith.constant 0 : index
    %69 = vector.load %arg3[%c3_86, %c0_87, %c0_88, %c0_89] : memref<4x4x8x4xbf16, #tpu.memory_space<vmem>>, vector<1x1x8x4xbf16>
    %70 = vector.shape_cast %69 : vector<1x1x8x4xbf16> to vector<8x4xbf16>
    %c0_90 = arith.constant 0 : index
    %c0_91 = arith.constant 0 : index
    %c19_92 = arith.constant 19 : index
    %71 = vector.load %arg2[%c0_90, %c0_91, %c19_92] : memref<1x4x512xbf16, #tpu.memory_space<vmem>>, vector<1x4x384xbf16>
    %72 = vector.shape_cast %71 : vector<1x4x384xbf16> to vector<4x384xbf16>
    %cst_93 = arith.constant dense<0.000000e+00> : vector<8x384xf32>
    %73 = tpu.matmul %70, %72, %cst_93 {dimension_numbers = #tpu.dot_dimension_numbers<[1], [0], [0], [1], [0, 0, 1, 1], [], []>} : vector<8x4xbf16>, vector<4x384xbf16>, vector<8x384xf32> -> vector<8x384xf32>
    %c3_94 = arith.constant 3 : index
    %c1_95 = arith.constant 1 : index
    %c0_96 = arith.constant 0 : index
    %c0_97 = arith.constant 0 : index
    %74 = vector.load %arg3[%c3_94, %c1_95, %c0_96, %c0_97] : memref<4x4x8x4xbf16, #tpu.memory_space<vmem>>, vector<1x1x8x4xbf16>
    %75 = vector.shape_cast %74 : vector<1x1x8x4xbf16> to vector<8x4xbf16>
    %c0_98 = arith.constant 0 : index
    %c0_99 = arith.constant 0 : index
    %c20_100 = arith.constant 20 : index
    %76 = vector.load %arg2[%c0_98, %c0_99, %c20_100] : memref<1x4x512xbf16, #tpu.memory_space<vmem>>, vector<1x4x384xbf16>
    %77 = vector.shape_cast %76 : vector<1x4x384xbf16> to vector<4x384xbf16>
    %cst_101 = arith.constant dense<0.000000e+00> : vector<8x384xf32>
    %78 = tpu.matmul %75, %77, %cst_101 {dimension_numbers = #tpu.dot_dimension_numbers<[1], [0], [0], [1], [0, 0, 1, 1], [], []>} : vector<8x4xbf16>, vector<4x384xbf16>, vector<8x384xf32> -> vector<8x384xf32>
    %79 = arith.addf %73, %78 : vector<8x384xf32>
    %c3_102 = arith.constant 3 : index
    %c2_103 = arith.constant 2 : index
    %c0_104 = arith.constant 0 : index
    %c0_105 = arith.constant 0 : index
    %80 = vector.load %arg3[%c3_102, %c2_103, %c0_104, %c0_105] : memref<4x4x8x4xbf16, #tpu.memory_space<vmem>>, vector<1x1x8x4xbf16>
    %81 = vector.shape_cast %80 : vector<1x1x8x4xbf16> to vector<8x4xbf16>
    %c0_106 = arith.constant 0 : index
    %c0_107 = arith.constant 0 : index
    %c37_108 = arith.constant 37 : index
    %82 = vector.load %arg2[%c0_106, %c0_107, %c37_108] : memref<1x4x512xbf16, #tpu.memory_space<vmem>>, vector<1x4x384xbf16>
    %83 = vector.shape_cast %82 : vector<1x4x384xbf16> to vector<4x384xbf16>
    %cst_109 = arith.constant dense<0.000000e+00> : vector<8x384xf32>
    %84 = tpu.matmul %81, %83, %cst_109 {dimension_numbers = #tpu.dot_dimension_numbers<[1], [0], [0], [1], [0, 0, 1, 1], [], []>} : vector<8x4xbf16>, vector<4x384xbf16>, vector<8x384xf32> -> vector<8x384xf32>
    %85 = arith.addf %79, %84 : vector<8x384xf32>
    %c3_110 = arith.constant 3 : index
    %c3_111 = arith.constant 3 : index
    %c0_112 = arith.constant 0 : index
    %c0_113 = arith.constant 0 : index
    %86 = vector.load %arg3[%c3_110, %c3_111, %c0_112, %c0_113] : memref<4x4x8x4xbf16, #tpu.memory_space<vmem>>, vector<1x1x8x4xbf16>
    %87 = vector.shape_cast %86 : vector<1x1x8x4xbf16> to vector<8x4xbf16>
    %c0_114 = arith.constant 0 : index
    %c0_115 = arith.constant 0 : index
    %c38 = arith.constant 38 : index
    %88 = vector.load %arg2[%c0_114, %c0_115, %c38] : memref<1x4x512xbf16, #tpu.memory_space<vmem>>, vector<1x4x384xbf16>
    %89 = vector.shape_cast %88 : vector<1x4x384xbf16> to vector<4x384xbf16>
    %cst_116 = arith.constant dense<0.000000e+00> : vector<8x384xf32>
    %90 = tpu.matmul %87, %89, %cst_116 {dimension_numbers = #tpu.dot_dimension_numbers<[1], [0], [0], [1], [0, 0, 1, 1], [], []>} : vector<8x4xbf16>, vector<4x384xbf16>, vector<8x384xf32> -> vector<8x384xf32>
    %91 = arith.addf %85, %90 : vector<8x384xf32>
    %c0_117 = arith.constant 0 : index
    %c0_118 = arith.constant 0 : index
    %92 = vector.load %arg4[%c0_117, %c0_118] : memref<1x384xf32, #tpu.memory_space<vmem>>, vector<1x384xf32>
    %93 = vector.broadcast %92 : vector<1x384xf32> to vector<8x384xf32>
    %94 = arith.mulf %22, %93 : vector<8x384xf32>
    %cst_119 = arith.constant dense<0.000000e+00> : vector<8xf32>
    %95 = vector.multi_reduction <add>, %94, %cst_119 [1] : vector<8x384xf32> to vector<8xf32>
    %96 = vector.shape_cast %95 : vector<8xf32> to vector<8x1xf32>
    %97 = vector.broadcast %92 : vector<1x384xf32> to vector<8x384xf32>
    %98 = arith.mulf %45, %97 : vector<8x384xf32>
    %cst_120 = arith.constant dense<0.000000e+00> : vector<8xf32>
    %99 = vector.multi_reduction <add>, %98, %cst_120 [1] : vector<8x384xf32> to vector<8xf32>
    %100 = vector.shape_cast %99 : vector<8xf32> to vector<8x1xf32>
    %101 = arith.addf %96, %100 : vector<8x1xf32>
    %102 = vector.broadcast %92 : vector<1x384xf32> to vector<8x384xf32>
    %103 = arith.mulf %68, %102 : vector<8x384xf32>
    %cst_121 = arith.constant dense<0.000000e+00> : vector<8xf32>
    %104 = vector.multi_reduction <add>, %103, %cst_121 [1] : vector<8x384xf32> to vector<8xf32>
    %105 = vector.shape_cast %104 : vector<8xf32> to vector<8x1xf32>
    %106 = arith.addf %101, %105 : vector<8x1xf32>
    %107 = vector.broadcast %92 : vector<1x384xf32> to vector<8x384xf32>
    %108 = arith.mulf %91, %107 : vector<8x384xf32>
    %cst_122 = arith.constant dense<0.000000e+00> : vector<8xf32>
    %109 = vector.multi_reduction <add>, %108, %cst_122 [1] : vector<8x384xf32> to vector<8xf32>
    %110 = vector.shape_cast %109 : vector<8xf32> to vector<8x1xf32>
    %111 = arith.addf %106, %110 : vector<8x1xf32>
    %cst_123 = arith.constant 9.765625E-4 : f32
    %112 = vector.broadcast %cst_123 : f32 to vector<8x1xf32>
    %113 = arith.mulf %111, %112 : vector<8x1xf32>
    %114 = vector.broadcast %113 : vector<8x1xf32> to vector<8x384xf32>
    %115 = arith.subf %22, %114 : vector<8x384xf32>
    %116 = arith.mulf %115, %115 : vector<8x384xf32>
    %117 = vector.broadcast %92 : vector<1x384xf32> to vector<8x384xf32>
    %118 = arith.mulf %116, %117 : vector<8x384xf32>
    %cst_124 = arith.constant dense<0.000000e+00> : vector<8xf32>
    %119 = vector.multi_reduction <add>, %118, %cst_124 [1] : vector<8x384xf32> to vector<8xf32>
    %120 = vector.shape_cast %119 : vector<8xf32> to vector<8x1xf32>
    %121 = vector.broadcast %113 : vector<8x1xf32> to vector<8x384xf32>
    %122 = arith.subf %45, %121 : vector<8x384xf32>
    %123 = arith.mulf %122, %122 : vector<8x384xf32>
    %124 = vector.broadcast %92 : vector<1x384xf32> to vector<8x384xf32>
    %125 = arith.mulf %123, %124 : vector<8x384xf32>
    %cst_125 = arith.constant dense<0.000000e+00> : vector<8xf32>
    %126 = vector.multi_reduction <add>, %125, %cst_125 [1] : vector<8x384xf32> to vector<8xf32>
    %127 = vector.shape_cast %126 : vector<8xf32> to vector<8x1xf32>
    %128 = arith.addf %120, %127 : vector<8x1xf32>
    %129 = vector.broadcast %113 : vector<8x1xf32> to vector<8x384xf32>
    %130 = arith.subf %68, %129 : vector<8x384xf32>
    %131 = arith.mulf %130, %130 : vector<8x384xf32>
    %132 = vector.broadcast %92 : vector<1x384xf32> to vector<8x384xf32>
    %133 = arith.mulf %131, %132 : vector<8x384xf32>
    %cst_126 = arith.constant dense<0.000000e+00> : vector<8xf32>
    %134 = vector.multi_reduction <add>, %133, %cst_126 [1] : vector<8x384xf32> to vector<8xf32>
    %135 = vector.shape_cast %134 : vector<8xf32> to vector<8x1xf32>
    %136 = arith.addf %128, %135 : vector<8x1xf32>
    %137 = vector.broadcast %113 : vector<8x1xf32> to vector<8x384xf32>
    %138 = arith.subf %91, %137 : vector<8x384xf32>
    %139 = arith.mulf %138, %138 : vector<8x384xf32>
    %140 = vector.broadcast %92 : vector<1x384xf32> to vector<8x384xf32>
    %141 = arith.mulf %139, %140 : vector<8x384xf32>
    %cst_127 = arith.constant dense<0.000000e+00> : vector<8xf32>
    %142 = vector.multi_reduction <add>, %141, %cst_127 [1] : vector<8x384xf32> to vector<8xf32>
    %143 = vector.shape_cast %142 : vector<8xf32> to vector<8x1xf32>
    %144 = arith.addf %136, %143 : vector<8x1xf32>
    %cst_128 = arith.constant 9.765625E-4 : f32
    %145 = vector.broadcast %cst_128 : f32 to vector<8x1xf32>
    %146 = arith.mulf %144, %145 : vector<8x1xf32>
    %cst_129 = arith.constant 9.99999974E-6 : f32
    %147 = vector.broadcast %cst_129 : f32 to vector<8x1xf32>
    %148 = arith.addf %146, %147 : vector<8x1xf32>
    %149 = math.rsqrt %148 : vector<8x1xf32>
    %150 = vector.broadcast %113 : vector<8x1xf32> to vector<8x384xf32>
    %151 = arith.subf %22, %150 : vector<8x384xf32>
    %152 = vector.broadcast %149 : vector<8x1xf32> to vector<8x384xf32>
    %153 = arith.mulf %151, %152 : vector<8x384xf32>
    %cst_130 = arith.constant 0.000000e+00 : f32
    %154 = vector.broadcast %cst_130 : f32 to vector<8x384xf32>
    %155 = arith.maximumf %153, %154 : vector<8x384xf32>
    %c0_131 = arith.constant 0 : index
    %c0_132 = arith.constant 0 : index
    %c0_133 = arith.constant 0 : index
    %c0_134 = arith.constant 0 : index
    %156 = vector.load %arg5[%c0_131, %c0_132, %c0_133, %c0_134] : memref<1x4x8x384xf32, #tpu.memory_space<vmem>>, vector<1x1x8x384xf32>
    %157 = vector.shape_cast %156 : vector<1x1x8x384xf32> to vector<8x384xf32>
    %158 = vector.shape_cast %155 : vector<8x384xf32> to vector<1x1x8x384xf32>
    tpu.vector_store %arg5[%c0_131, %c0_132, %c0_133, %c0_134], %158 {strides = array<i32>} : memref<1x4x8x384xf32, #tpu.memory_space<vmem>>, vector<1x1x8x384xf32>,
    %159 = vector.broadcast %113 : vector<8x1xf32> to vector<8x384xf32>
    %160 = arith.subf %45, %159 : vector<8x384xf32>
    %161 = vector.broadcast %149 : vector<8x1xf32> to vector<8x384xf32>
    %162 = arith.mulf %160, %161 : vector<8x384xf32>
    %cst_135 = arith.constant 0.000000e+00 : f32
    %163 = vector.broadcast %cst_135 : f32 to vector<8x384xf32>
    %164 = arith.maximumf %162, %163 : vector<8x384xf32>
    %c0_136 = arith.constant 0 : index
    %c1_137 = arith.constant 1 : index
    %c0_138 = arith.constant 0 : index
    %c0_139 = arith.constant 0 : index
    %165 = vector.load %arg5[%c0_136, %c1_137, %c0_138, %c0_139] : memref<1x4x8x384xf32, #tpu.memory_space<vmem>>, vector<1x1x8x384xf32>
    %166 = vector.shape_cast %165 : vector<1x1x8x384xf32> to vector<8x384xf32>
    %167 = vector.shape_cast %164 : vector<8x384xf32> to vector<1x1x8x384xf32>
    tpu.vector_store %arg5[%c0_136, %c1_137, %c0_138, %c0_139], %167 {strides = array<i32>} : memref<1x4x8x384xf32, #tpu.memory_space<vmem>>, vector<1x1x8x384xf32>,
    %168 = vector.broadcast %113 : vector<8x1xf32> to vector<8x384xf32>
    %169 = arith.subf %68, %168 : vector<8x384xf32>
    %170 = vector.broadcast %149 : vector<8x1xf32> to vector<8x384xf32>
    %171 = arith.mulf %169, %170 : vector<8x384xf32>
    %cst_140 = arith.constant 0.000000e+00 : f32
    %172 = vector.broadcast %cst_140 : f32 to vector<8x384xf32>
    %173 = arith.maximumf %171, %172 : vector<8x384xf32>
    %c0_141 = arith.constant 0 : index
    %c2_142 = arith.constant 2 : index
    %c0_143 = arith.constant 0 : index
    %c0_144 = arith.constant 0 : index
    %174 = vector.load %arg5[%c0_141, %c2_142, %c0_143, %c0_144] : memref<1x4x8x384xf32, #tpu.memory_space<vmem>>, vector<1x1x8x384xf32>
    %175 = vector.shape_cast %174 : vector<1x1x8x384xf32> to vector<8x384xf32>
    %176 = vector.shape_cast %173 : vector<8x384xf32> to vector<1x1x8x384xf32>
    tpu.vector_store %arg5[%c0_141, %c2_142, %c0_143, %c0_144], %176 {strides = array<i32>} : memref<1x4x8x384xf32, #tpu.memory_space<vmem>>, vector<1x1x8x384xf32>,
    %177 = vector.broadcast %113 : vector<8x1xf32> to vector<8x384xf32>
    %178 = arith.subf %91, %177 : vector<8x384xf32>
    %179 = vector.broadcast %149 : vector<8x1xf32> to vector<8x384xf32>
    %180 = arith.mulf %178, %179 : vector<8x384xf32>
    %cst_145 = arith.constant 0.000000e+00 : f32
    %181 = vector.broadcast %cst_145 : f32 to vector<8x384xf32>
    %182 = arith.maximumf %180, %181 : vector<8x384xf32>
    %c0_146 = arith.constant 0 : index
    %c3_147 = arith.constant 3 : index
    %c0_148 = arith.constant 0 : index
    %c0_149 = arith.constant 0 : index
    %183 = vector.load %arg5[%c0_146, %c3_147, %c0_148, %c0_149] : memref<1x4x8x384xf32, #tpu.memory_space<vmem>>, vector<1x1x8x384xf32>
    %184 = vector.shape_cast %183 : vector<1x1x8x384xf32> to vector<8x384xf32>
    %185 = vector.shape_cast %182 : vector<8x384xf32> to vector<1x1x8x384xf32>
    tpu.vector_store %arg5[%c0_146, %c3_147, %c0_148, %c0_149], %185 {strides = array<i32>} : memref<1x4x8x384xf32, #tpu.memory_space<vmem>>, vector<1x1x8x384xf32>,
    return
  }
  func.func @transform_0(%arg0: i32, %arg1: i32) -> (i32, i32, i32) {
    %c0_i32 = arith.constant 0 : i32
    %c0_i32_0 = arith.constant 0 : i32
    %c0_i32_1 = arith.constant 0 : i32
    return %arg1, %c0_i32, %c0_i32_0 : i32, i32, i32
  }
  func.func @transform_1(%arg0: i32, %arg1: i32) -> (i32, i32, i32, i32) {
    %c0_i32 = arith.constant 0 : i32
    %c0_i32_0 = arith.constant 0 : i32
    %c0_i32_1 = arith.constant 0 : i32
    %c0_i32_2 = arith.constant 0 : i32
    return %c0_i32, %c0_i32_0, %arg0, %c0_i32_1 : i32, i32, i32, i32
  }
  func.func @transform_2(%arg0: i32, %arg1: i32) -> (i32, i32) {
    %c0_i32 = arith.constant 0 : i32
    %c0_i32_0 = arith.constant 0 : i32
    %c0_i32_1 = arith.constant 0 : i32
    return %c0_i32, %c0_i32_0 : i32, i32
  }
  func.func @transform_3(%arg0: i32, %arg1: i32) -> (i32, i32, i32, i32) {
    %c0_i32 = arith.constant 0 : i32
    %c0_i32_0 = arith.constant 0 : i32
    %c0_i32_1 = arith.constant 0 : i32
    return %arg1, %c0_i32, %arg0, %c0_i32_0 : i32, i32, i32, i32
  }
}

</mosaic_0001>

<bundles_post_ra>
// kernel: unet_up.1
= control target key start
LH: loop header
LB: loop body
LE: loop exit
PB: predicated region body
PF: predicated region fallthrough
CT: control target
= control target key end

     0   :  { %s1827_s12 = smov 0   ;;  %s1829_s13 = smov 0   ;;  %s2266_s0 = inlined_call_operand.vmem [shape: bf16[2,4,512], index: 0, kind: input, shape index: {}]   ;;  %s2267_s1 = inlined_call_operand.vmem [shape: bf16[4,4,8,4], index: 1, kind: input, shape index: {}]   ;;  %s2268_s2 = inlined_call_operand.vmem [shape: f32[1,384], index: 2, kind: input, shape index: {}]   ;;  %s2269_s3 = inlined_call_operand.vmem [shape: f32[2,4,8,384], index: 3, kind: output, shape index: {}]  }
   0x1   :  { %s1831_s14 = smov 0  }
   0x2 LB: > { %s22_s15 = sadd.s32 1, %s1793_s13  ;;  %p1661_p0 = scmp.ge.s32.totalorder %s1797_s14, 1  ;;  %s1797_s14 = sphi %s1831_s14, %s13_s14   ;;  %s1793_s13 = sphi %s1829_s13, %s2271_s13   ;;  %s1789_s12 = sphi %s1827_s12, %s2270_s12  }
   0x3   : > { %p23_p1 = scmp.ge.s32.totalorder %s22_s15, 2  ;;  %p160_p2 = scmp.lt.s32.totalorder %s1797_s14, 3 }
   0x5   : > { %s2273_s15 = smov (%p23_p1, %s22_s15), 0  ;;  %p161_p3 = pnand %p1661_p0, %p160_p2 }
   0x6   : > { %p192_p4 = scmp.lt.s32.totalorder (!%p161_p3), %s1789_s12, 1  ;;  %s1799_s20 = smov (!%p161_p3), 127  }
   0x7   : > { %164 = sbr.rel (%p161_p3) target bundleno = 767 (0x2ff), region = 32  ;;  %s1800_s21 = smov (!%p161_p3), 110  }
   0x8   : > { %s1801_s22 = smov (!%p161_p3), 109   ;;  %s1802_s23 = smov (!%p161_p3), 126  }
   0x9   : > { %s1803_s24 = smov (!%p161_p3), 108   ;;  %s1804_s27 = smov (!%p161_p3), 92  }
   0xa   : > { %s1805_s28 = smov (!%p161_p3), 91   ;;  %s1806_s8 = smov (!%p161_p3), 90  }
   0xc   : > { %s2275_s12 = smov (!%p192_p4, %s1789_s12), 1  ;;  %vm242_vm0 = vcmask 1041408   ;;  %v1903_v46 = vld [vmem:[%s2267_s1] sm:$0xf]  ;;  %vm238_vm1 = vcmask 31744   ;;  %vm365_vm2 = vcmask 900096  }
   0xd   : > { %s1739_s16 = sshll.u32 %s2275_s12, 3  ;;  %vm234_vm3 = vcmask 1039360   ;;  %vm444_vm4 = vcmask 891904   ;;  %vm525_vm5 = vcmask 1031168   ;;  %vm748_vm6 = vcmask 883712  }
   0xe   : > { %s196_s19 = scalar_lea.vmem %s2266_s0, %s1739_s16  ;;  %vm973_vm7 = vcmask 752640   ;;  %vm1052_vm8 = vcmask 744448   ;;  %vm1353_vm9 = vcmask 736256   ;;  %s1740_s16 = smul.u32 96, %s2275_s12 }
   0xf   : > { %v1851_v0 = vld [vmem:[%s196_s19] sm:$0xff] }
  0x10   : > { %217 = vst [vmem:[#allocation1] ss:$4 sm:$0xff] %v1851_v0  ;;  %v212_v1 = vld [vmem:[%s196_s19] sm:$0x3f]  ;;  %s2237_s19 = scalar_lea.vmem %s2269_s3, %s1740_s16 }
  0x17   : > { %v222_v2 = vld.sshfl [vmem:[#allocation1 + $0x10] sm:$0xff pattern:$0x73625140]  ;;  %v218_v3 = vld.sshfl [vmem:[#allocation1] sm:$0xff pattern:$0x73625140] }
  0x18   : > { %230 = vrot.lane.b32.xlu0 %v222_v2, %s1799_s20  ;;  %226 = vrot.lane.b32.xlu1 %v218_v3, %s1799_s20  ;;  %v224_v4 = vld.sshfl [vmem:[#allocation1 + $0x18] sm:$0xff pattern:$0x73625140]  ;;  %v220_v5 = vld.sshfl [vmem:[#allocation1 + $0x8] sm:$0xff pattern:$0x73625140] }
  0x19   : > { %292 = vst [vmem:[#allocation1] ss:$4 sm:$0xff] %v212_v1 }
  0x20   : > { %232 = vrot.lane.b32.xlu0 %v224_v4, %s1799_s20  ;;  %228 = vrot.lane.b32.xlu1 %v220_v5, %s1799_s20  ;;  %v1858_v6 = vld.sshfl [vmem:[#allocation1] sm:$0xff pattern:$0x73625140]  ;;  %v1860_v7 = vld.sshfl [vmem:[#allocation1 + $0x8] sm:$0xff pattern:$0x73625140] }
  0x21   : > { %v1862_v8 = vld.sshfl [vmem:[#allocation1 + $0x10] sm:$0xff pattern:$0x73625140]  ;;  %v299_v45 = vsel %vm242_vm0, %v1858_v6, 0  ;;  %v301_v3 = vsel %vm242_vm0, %v1860_v7, 0 }
  0x22   : > { %348 = vst [vmem:[#allocation1] ss:$4 sm:$0xff] %v1851_v0  ;;  %312 = vmatpush.bf16.msra.mxu3 %v299_v45 }
  0x25   : > { %1669 = vmatmul.msk.bf16.vlgmr.msra.gmra.mxu3 %vm238_vm1, %v1903_v46 }
  0x29   : > { %v353_v9 = vld.sshfl [vmem:[#allocation1 + $0x10] sm:$0xff pattern:$0x73625140]  ;;  %v355_v10 = vld.sshfl [vmem:[#allocation1 + $0x18] sm:$0xff pattern:$0x73625140] }
  0x2a   : > { %361 = vrot.lane.b32.xlu0 %v353_v9, %s1800_s21  ;;  %v351_v11 = vld.sshfl [vmem:[#allocation1 + $0x8] sm:$0xff pattern:$0x73625140]  ;;  %v349_v12 = vld.sshfl [vmem:[#allocation1] sm:$0xff pattern:$0x73625140] }
  0x2b   : > { %357 = vrot.lane.b32.xlu2 %v349_v12, %s1800_s21  ;;  %427 = vst [vmem:[#allocation1] ss:$4 sm:$0xff] %v1851_v0  ;;  %v303_v9 = vsel %vm242_vm0, %v1862_v8, 0 }
  0x32   : > { %v434_v13 = vld.sshfl [vmem:[#allocation1 + $0x18] sm:$0xff pattern:$0x73625140]  ;;  %v428_v14 = vld.sshfl [vmem:[#allocation1] sm:$0xff pattern:$0x73625140] }
  0x33   : > { %442 = vrot.lane.b32.xlu0 %v434_v13, %s1801_s22  ;;  %v432_v15 = vld.sshfl [vmem:[#allocation1 + $0x10] sm:$0xff pattern:$0x73625140]  ;;  %v430_v16 = vld.sshfl [vmem:[#allocation1 + $0x8] sm:$0xff pattern:$0x73625140]  ;;  %359 = vrot.lane.b32.xlu2 %v351_v11, %s1800_s21 }
  0x34   : > { %438 = vrot.lane.b32.xlu1 %v430_v16, %s1801_s22  ;;  %508 = vst [vmem:[#allocation1] ss:$4 sm:$0xff] %v1851_v0  ;;  %v1665_v13 = vld [vmem:[%s2267_s1 + $0x4] sm:$0xf] }
  0x3b   : > { %v513_v17 = vld.sshfl [vmem:[#allocation1 + $0x10] sm:$0xff pattern:$0x73625140]  ;;  %v509_v18 = vld.sshfl [vmem:[#allocation1] sm:$0xff pattern:$0x73625140]  ;;  %440 = vrot.lane.b32.xlu2 %v432_v15, %s1801_s22 }
  0x3c   : > { %363 = vrot.lane.b32.xlu1 %v355_v10, %s1800_s21  ;;  %521 = vrot.lane.b32.xlu0 %v513_v17, %s1802_s23  ;;  %v511_v19 = vld.sshfl [vmem:[#allocation1 + $0x8] sm:$0xff pattern:$0x73625140]  ;;  %v515_v20 = vld.sshfl [vmem:[#allocation1 + $0x18] sm:$0xff pattern:$0x73625140] }
  0x3d   : > { %580 = vst [vmem:[#allocation1] ss:$4 sm:$0xff] %v1851_v0 }
  0x43   : > { %436 = vrot.lane.b32.xlu2 %v428_v14, %s1801_s22 }
  0x44   : > { %523 = vrot.lane.b32.xlu1 %v515_v20, %s1802_s23  ;;  %v583_v21 = vld.sshfl [vmem:[#allocation1 + $0x8] sm:$0xff pattern:$0x73625140]  ;;  %v585_v22 = vld.sshfl [vmem:[#allocation1 + $0x10] sm:$0xff pattern:$0x73625140] }
  0x45   : > { %v587_v23 = vld.sshfl [vmem:[#allocation1 + $0x18] sm:$0xff pattern:$0x73625140]  ;;  %591 = vrot.lane.b32.xlu0 %v583_v21, %s1799_s20  ;;  %v581_v24 = vld.sshfl [vmem:[#allocation1] sm:$0xff pattern:$0x73625140] }
  0x46   : > { %653 = vst [vmem:[#allocation1] ss:$4 sm:$0xff] %v1851_v0 }
  0x4b   : > { %589 = vrot.lane.b32.xlu2 %v581_v24, %s1799_s20 }
  0x4c   : > { %517 = vrot.lane.b32.xlu1 %v509_v18, %s1802_s23 }
  0x4d   : > { %v654_v25 = vld.sshfl [vmem:[#allocation1] sm:$0xff pattern:$0x73625140]  ;;  %v658_v26 = vld.sshfl [vmem:[#allocation1 + $0x10] sm:$0xff pattern:$0x73625140] }
  0x4e   : > { %v660_v27 = vld.sshfl [vmem:[#allocation1 + $0x18] sm:$0xff pattern:$0x73625140]  ;;  %662 = vrot.lane.b32.xlu0 %v654_v25, %s1801_s22  ;;  %v656_v28 = vld.sshfl [vmem:[#allocation1 + $0x8] sm:$0xff pattern:$0x73625140] }
  0x4f   : > { %731 = vst [vmem:[#allocation1] ss:$4 sm:$0xff] %v1851_v0 }
  0x53   : > { %519 = vrot.lane.b32.xlu2 %v511_v19, %s1802_s23 }
  0x54   : > { %664 = vrot.lane.b32.xlu1 %v656_v28, %s1801_s22 }
  0x56   : > { %593 = vrot.lane.b32.xlu0 %v585_v22, %s1799_s20  ;;  %v736_v29 = vld.sshfl [vmem:[#allocation1 + $0x10] sm:$0xff pattern:$0x73625140]  ;;  %v738_v30 = vld.sshfl [vmem:[#allocation1 + $0x18] sm:$0xff pattern:$0x73625140] }
  0x57   : > { %v732_v31 = vld.sshfl [vmem:[#allocation1] sm:$0xff pattern:$0x73625140]  ;;  %v734_v32 = vld.sshfl [vmem:[#allocation1 + $0x8] sm:$0xff pattern:$0x73625140] }
  0x58   : > { %810 = vst [vmem:[#allocation1] ss:$4 sm:$0xff] %v1851_v0 }
  0x5b   : > { %666 = vrot.lane.b32.xlu2 %v658_v26, %s1801_s22 }
  0x5c   : > { %595 = vrot.lane.b32.xlu1 %v587_v23, %s1799_s20 }
  0x5e   : > { %744 = vrot.lane.b32.xlu0 %v736_v29, %s1803_s24 }
  0x5f   : > { %v815_v33 = vld.sshfl [vmem:[#allocation1 + $0x10] sm:$0xff pattern:$0x73625140]  ;;  %v817_v34 = vld.sshfl [vmem:[#allocation1 + $0x18] sm:$0xff pattern:$0x73625140] }
  0x60   : > { %v811_v35 = vld.sshfl [vmem:[#allocation1] sm:$0xff pattern:$0x73625140]  ;;  %v813_v36 = vld.sshfl [vmem:[#allocation1 + $0x8] sm:$0xff pattern:$0x73625140] }
  0x61   : > { %881 = vst [vmem:[#allocation1] ss:$4 sm:$0xff] %v1851_v0 }
  0x63   : > { %742 = vrot.lane.b32.xlu2 %v734_v32, %s1803_s24 }
  0x64   : > { %746 = vrot.lane.b32.xlu1 %v738_v30, %s1803_s24 }
  0x66   : > { %740 = vrot.lane.b32.xlu0 %v732_v31, %s1803_s24 }
  0x68   : > { %v886_v37 = vld.sshfl [vmem:[#allocation1 + $0x10] sm:$0xff pattern:$0x73625140]  ;;  %v888_v38 = vld.sshfl [vmem:[#allocation1 + $0x18] sm:$0xff pattern:$0x73625140] }
  0x69   : > { %v882_v39 = vld.sshfl [vmem:[#allocation1] sm:$0xff pattern:$0x73625140]  ;;  %v884_v40 = vld.sshfl [vmem:[#allocation1 + $0x8] sm:$0xff pattern:$0x73625140] }
  0x6a   : > { %956 = vst [vmem:[#allocation1] ss:$4 sm:$0xff] %v1851_v0 }
  0x6b   : > { %668 = vrot.lane.b32.xlu2 %v660_v27, %s1801_s22 }
  0x6c   : > { %823 = vrot.lane.b32.xlu1 %v815_v33, %s1801_s22 }
  0x6e   : > { %890 = vrot.lane.b32.xlu0 %v882_v39, %s1800_s21 }
  0x71   : > { %v959_v41 = vld.sshfl [vmem:[#allocation1 + $0x8] sm:$0xff pattern:$0x73625140]  ;;  %v963_v42 = vld.sshfl [vmem:[#allocation1 + $0x18] sm:$0xff pattern:$0x73625140] }
  0x72   : > { %v961_v43 = vld.sshfl [vmem:[#allocation1 + $0x10] sm:$0xff pattern:$0x73625140]  ;;  %v957_v44 = vld.sshfl [vmem:[#allocation1] sm:$0xff pattern:$0x73625140] }
  0x73   : > { %1035 = vst [vmem:[#allocation1] ss:$4 sm:$0xff] %v1851_v0  ;;  %825 = vrot.lane.b32.xlu2 %v817_v34, %s1801_s22 }
  0x74   : > { %892 = vrot.lane.b32.xlu1 %v884_v40, %s1800_s21 }
  0x76   : > { %821 = vrot.lane.b32.xlu0 %v813_v36, %s1801_s22  ;;  %v1676_v36 = vld [vmem:[%s2267_s1 + $0xc] sm:$0xf] }
  0x7a   : > { %v1042_v47 = vld.sshfl [vmem:[#allocation1 + $0x18] sm:$0xff pattern:$0x73625140]  ;;  %v1038_v48 = vld.sshfl [vmem:[#allocation1 + $0x8] sm:$0xff pattern:$0x73625140] }
  0x7b   : > { %819 = vrot.lane.b32.xlu2 %v811_v35, %s1801_s22  ;;  %v1040_v49 = vld.sshfl [vmem:[#allocation1 + $0x10] sm:$0xff pattern:$0x73625140]  ;;  %v1036_v50 = vld.sshfl [vmem:[#allocation1] sm:$0xff pattern:$0x73625140] }
  0x7c   : > { %965 = vrot.lane.b32.xlu1 %v957_v44, %s1804_s27  ;;  %1114 = vst [vmem:[#allocation1] ss:$4 sm:$0xff] %v1851_v0 }
  0x7e   : > { %969 = vrot.lane.b32.xlu0 %v961_v43, %s1804_s27 }
  0x83   : > { %967 = vrot.lane.b32.xlu2 %v959_v41, %s1804_s27  ;;  %v1115_v51 = vld.sshfl [vmem:[#allocation1] sm:$0xff pattern:$0x73625140]  ;;  %v1910_v52 = vld.sshfl [vmem:[#allocation1 + $0x8] sm:$0xff pattern:$0x73625140] }
  0x84   : > { %894 = vrot.lane.b32.xlu1 %v886_v37, %s1800_s21  ;;  %v1119_v53 = vld.sshfl [vmem:[#allocation1 + $0x10] sm:$0xff pattern:$0x73625140]  ;;  %v1121_v54 = vld.sshfl [vmem:[#allocation1 + $0x18] sm:$0xff pattern:$0x73625140] }
  0x85   : > { %v358_v55 = vpop.permute.xlu2 %357  ;;  %1185 = vst [vmem:[#allocation1] ss:$4 sm:$0xff] %v1851_v0 }
  0x86   : > { %1046 = vrot.lane.b32.xlu0 %v1038_v48, %s1805_s28 }
  0x8a   : > { %v231_v56 = vpop.permute.xlu0 %230  ;;  %v227_v57 = vpop.permute.xlu1 %226 }
  0x8b   : > { %896 = vrot.lane.b32.xlu2 %v888_v38, %s1800_s21 }
  0x8c   : > { %1048 = vrot.lane.b32.xlu1 %v1040_v49, %s1805_s28  ;;  %v1188_v58 = vld.sshfl [vmem:[#allocation1 + $0x8] sm:$0xff pattern:$0x73625140]  ;;  %v1917_v59 = vld.sshfl [vmem:[#allocation1 + $0x10] sm:$0xff pattern:$0x73625140] }
  0x8d   : > { %v360_v60 = vpop.permute.xlu2 %359  ;;  %v1919_v61 = vld.sshfl [vmem:[#allocation1 + $0x18] sm:$0xff pattern:$0x73625140]  ;;  %v1186_v62 = vld.sshfl [vmem:[#allocation1] sm:$0xff pattern:$0x73625140] }
  0x8e   : > { %971 = vrot.lane.b32.xlu0 %v963_v42, %s1804_s27  ;;  %1258 = vst [vmem:[#allocation1] ss:$4 sm:$0xff] %v1851_v0  ;;  %v366_v63 = vsel %vm365_vm2, %v358_v55, %v360_v60 }
  0x8f   : > { %v373_v7 = vsel %vm242_vm0, %v366_v63, 0 }
  0x92   : > { %v233_v1 = vpop.permute.xlu0 %232  ;;  %v229_v2 = vpop.permute.xlu1 %228 }
  0x93   : > { %v235_v4 = vsel %vm234_vm3, %v227_v57, %v229_v2  ;;  %v236_v5 = vsel %vm234_vm3, %v229_v2, %v231_v56  ;;  %v237_v6 = vsel %vm234_vm3, %v231_v56, %v233_v1  ;;  %1050 = vrot.lane.b32.xlu2 %v1042_v47, %s1805_s28  ;;  %v1681_v56 = vld [vmem:[%s2267_s1 + $0x14] sm:$0xf] }
  0x94   : > { %1044 = vrot.lane.b32.xlu1 %v1036_v50, %s1805_s28  ;;  %v244_v10 = vsel %vm242_vm0, %v235_v4, 0  ;;  %v247_v11 = vsel %vm242_vm0, %v236_v5, 0  ;;  %v250_v12 = vsel %vm242_vm0, %v237_v6, 0 }
  0x95   : > { %259 = vmatpush.bf16.msra.mxu0 %v244_v10  ;;  %272 = vmatpush.bf16.msra.mxu1 %v247_v11  ;;  %v1259_v14 = vld.sshfl [vmem:[#allocation1] sm:$0xff pattern:$0x73625140]  ;;  %v1261_v15 = vld.sshfl [vmem:[#allocation1 + $0x8] sm:$0xff pattern:$0x73625140]  ;;  %v441_v16 = vpop.permute.xlu2 %440 }
  0x96   : > { %285 = vmatpush.bf16.msra.mxu2 %v250_v12  ;;  %v1939_v8 = vld.sshfl [vmem:[#allocation1 + $0x18] sm:$0xff pattern:$0x73625140]  ;;  %1129 = vrot.lane.b32.xlu0 %v1121_v54, %s1803_s24  ;;  %v1263_v17 = vld.sshfl [vmem:[#allocation1 + $0x10] sm:$0xff pattern:$0x73625140] }
  0x97   : > { %1336 = vst [vmem:[#allocation1] ss:$4 sm:$0xff] %v1851_v0  ;;  %v1672_v0 = vld [vmem:[%s2267_s1 + $0x8] sm:$0xf]  ;;  %v1688_v10 = vld [vmem:[%s2267_s1 + $0x18] sm:$0xf] }
  0x98   : > { %1666 = vmatmul.msk.bf16.vlgmr.msra.gmra.mxu0 %vm238_vm1, %v1665_v13  ;;  %1667 = vmatmul.msk.bf16.vlgmr.msra.gmra.mxu1 %vm238_vm1, %v1665_v13 }
  0x99   : > { %325 = vmatpush.bf16.msrb.mxu0 %v301_v3  ;;  %1668 = vmatmul.msk.bf16.vlgmr.msra.gmra.mxu2 %vm238_vm1, %v1665_v13 }
  0x9a   : > { %388 = vmatpush.bf16.msrb.mxu2 %v373_v7  ;;  %338 = vmatpush.bf16.msrb.mxu1 %v303_v9 }
  0x9b   : > { %1127 = vrot.lane.b32.xlu2 %v1119_v53, %s1803_s24 }
  0x9c   : > { %1194 = vrot.lane.b32.xlu1 %v1186_v62, %s1801_s22  ;;  %v362_v18 = vpop.permute.xlu0 %361 }
  0x9d   : > { %v367_v19 = vsel %vm365_vm2, %v360_v60, %v362_v18  ;;  %v437_v20 = vpop.permute.xlu2 %436 }
  0x9e   : > { %v376_v21 = vsel %vm242_vm0, %v367_v19, 0  ;;  %1123 = vrot.lane.b32.xlu0 %v1115_v51, %s1803_s24  ;;  %v1339_v39 = vld.sshfl [vmem:[#allocation1 + $0x8] sm:$0xff pattern:$0x73625140] }
  0x9f   : > { %401 = vmatpush.bf16.msrb.mxu3 %v376_v21  ;;  %v1343_v40 = vld.sshfl [vmem:[#allocation1 + $0x18] sm:$0xff pattern:$0x73625140]  ;;  %v1341_v48 = vld.sshfl [vmem:[#allocation1 + $0x10] sm:$0xff pattern:$0x73625140] }
  0xa0   : > { %v1337_v55 = vld.sshfl [vmem:[#allocation1] sm:$0xff pattern:$0x73625140] }
  0xa2   : > { %1674 = vmatmul.msk.bf16.vlgmr.msrb.gmra.mxu3 %vm238_vm1, %v1672_v0 }
  0xa3   : > { %1196 = vrot.lane.b32.xlu2 %v1188_v58, %s1801_s22 }
  0xa4   : > { %1125 = vrot.lane.b32.xlu1 %v1910_v52, %s1803_s24  ;;  %v1680_v52 = vld [vmem:[%s2267_s1 + $0x10] sm:$0xf] }
  0xa5   : > { %v443_v22 = vpop.permute.xlu0 %442  ;;  %v590_v23 = vpop.permute.xlu2 %589 }
  0xa6   : > { %v447_v24 = vsel %vm444_vm4, %v441_v16, %v443_v22  ;;  %v439_v25 = vpop.permute.xlu1 %438  ;;  %1269 = vrot.lane.b32.xlu0 %v1261_v15, %s1805_s28  ;;  %v1692_v22 = vld [vmem:[%s2267_s1 + $0x1c] sm:$0xf] }
  0xa7   : > { %v458_v26 = vsel %vm242_vm0, %v447_v24, 0  ;;  %v446_v27 = vsel %vm444_vm4, %v439_v25, %v441_v16  ;;  %v445_v28 = vsel %vm444_vm4, %v437_v20, %v439_v25 }
  0xa8   : > { %v455_v29 = vsel %vm242_vm0, %v446_v27, 0  ;;  %v452_v30 = vsel %vm242_vm0, %v445_v28, 0  ;;  %1670 = vmatmul.msk.bf16.vlgmr.msrb.gmra.mxu0 %vm238_vm1, %v1903_v46  ;;  %1671 = vmatmul.msk.bf16.vlgmr.msrb.gmra.mxu1 %vm238_vm1, %v1903_v46 }
  0xa9   : > { %1673 = vmatmul.msk.bf16.vlgmr.msrb.gmra.mxu2 %vm238_vm1, %v1672_v0  ;;  %467 = vmatpush.bf16.msra.mxu1 %v452_v30 }
  0xaa   : > { %480 = vmatpush.bf16.msra.mxu2 %v455_v29  ;;  %493 = vmatpush.bf16.msra.mxu3 %v458_v26 }
  0xab   : > { %1267 = vrot.lane.b32.xlu2 %v1259_v14, %s1805_s28 }
  0xac   : > { %1271 = vrot.lane.b32.xlu1 %v1263_v17, %s1805_s28 }
  0xad   : > { %v520_v31 = vpop.permute.xlu2 %519 }
  0xae   : > { %v364_v32 = vpop.permute.xlu1 %363  ;;  %v522_v33 = vpop.permute.xlu0 %521  ;;  %1200 = vrot.lane.b32.xlu0 %v1919_v61, %s1801_s22 }
  0xaf   : > { %v368_v34 = vsel %vm365_vm2, %v362_v18, %v364_v32  ;;  %v527_v35 = vsel %vm525_vm5, %v520_v31, %v522_v33 }
  0xb0   : > { %v379_v37 = vsel %vm242_vm0, %v368_v34, 0  ;;  %v536_v38 = vsel %vm242_vm0, %v527_v35, 0 }
  0xb1   : > { %414 = vmatpush.bf16.msra.mxu0 %v379_v37  ;;  %561 = vmatpush.bf16.msrb.mxu1 %v536_v38  ;;  %v1696_v37 = vld [vmem:[%s2267_s1 + $0x20] sm:$0xf] }
  0xb2   : > { %1679 = vmatmul.msk.bf16.vlgmr.msra.gmra.mxu3 %vm238_vm1, %v1676_v36 }
  0xb3   : > { %1198 = vrot.lane.b32.xlu2 %v1917_v59, %s1801_s22 }
  0xb4   : > { %1347 = vrot.lane.b32.xlu1 %v1339_v39, %s1806_s8 }
  0xb5   : > { %v667_v41 = vpop.permute.xlu2 %666 }
  0xb6   : > { %v524_v42 = vpop.permute.xlu1 %523  ;;  %1351 = vrot.lane.b32.xlu0 %v1343_v40, %s1806_s8 }
  0xb7   : > { %v528_v43 = vsel %vm525_vm5, %v522_v33, %v524_v42  ;;  %v592_v44 = vpop.permute.xlu0 %591  ;;  %v1697_v42 = vld [vmem:[%s2267_s1 + $0x24] sm:$0xf] }
  0xb8   : > { %v539_v45 = vsel %vm242_vm0, %v528_v43, 0  ;;  %v597_v46 = vsel %vm234_vm3, %v590_v23, %v592_v44  ;;  %1675 = vmatmul.msk.bf16.vlgmr.msra.gmra.mxu0 %vm238_vm1, %v1672_v0  ;;  %1677 = vmatmul.msk.bf16.vlgmr.msra.gmra.mxu1 %vm238_vm1, %v1676_v36 }
  0xb9   : > { %v604_v47 = vsel %vm242_vm0, %v597_v46, 0  ;;  %574 = vmatpush.bf16.msrb.mxu2 %v539_v45 }
  0xba   : > { %1678 = vmatmul.msk.bf16.vlgmr.msra.gmra.mxu2 %vm238_vm1, %v1676_v36  ;;  %619 = vmatpush.bf16.msrb.mxu3 %v604_v47 }
  0xbb   : > { %1349 = vrot.lane.b32.xlu2 %v1341_v48, %s1806_s8 }
  0xbc   : > { %1273 = vrot.lane.b32.xlu1 %v1939_v8, %s1805_s28 }
  0xbd   : > { %v743_v49 = vpop.permute.xlu2 %742 }
  0xbe   : > { %v518_v50 = vpop.permute.xlu1 %517 }
  0xbf   : > { %v526_v51 = vsel %vm525_vm5, %v518_v50, %v520_v31  ;;  %v2061_v50 = vpop.f32.mrf.mxu3 }
  0xc0   : > { %v533_v53 = vsel %vm242_vm0, %v526_v51, 0  ;;  %v663_v54 = vpop.permute.xlu0 %662 }
  0xc1   : > { %548 = vmatpush.bf16.msrb.mxu0 %v533_v53 }
  0xc2   : > { %1685 = vmatmul.msk.bf16.vlgmr.msrb.gmra.mxu3 %vm238_vm1, %v1680_v52 }
  0xc3   : > { %1345 = vrot.lane.b32.xlu2 %v1337_v55, %s1806_s8  ;;  %v1704_v55 = vld [vmem:[%s2267_s1 + $0x28] sm:$0xf] }
  0xc5   : > { %v669_v57 = vpop.permute.xlu2 %668 }
  0xc6   : > { %v665_v58 = vpop.permute.xlu1 %664  ;;  %v672_v59 = vsel %vm444_vm4, %v667_v41, %v669_v57 }
  0xc7   : > { %v670_v60 = vsel %vm444_vm4, %v663_v54, %v665_v58  ;;  %v671_v61 = vsel %vm444_vm4, %v665_v58, %v667_v41  ;;  %v683_v3 = vsel %vm242_vm0, %v672_v59, 0 }
  0xc8   : > { %v677_v62 = vsel %vm242_vm0, %v670_v60, 0  ;;  %v680_v63 = vsel %vm242_vm0, %v671_v61, 0  ;;  %v594_v1 = vpop.permute.xlu0 %593  ;;  %1682 = vmatmul.msk.bf16.vlgmr.msrb.gmra.mxu0 %vm238_vm1, %v1681_v56  ;;  %1683 = vmatmul.msk.bf16.vlgmr.msrb.gmra.mxu1 %vm238_vm1, %v1681_v56  ;;  %v316_v61 = vpop.f32.mrf.mxu3 }
  0xc9   : > { %v598_v2 = vsel %vm234_vm3, %v592_v44, %v594_v1  ;;  %692 = vmatpush.bf16.msra.mxu2 %v677_v62  ;;  %705 = vmatpush.bf16.msra.mxu3 %v680_v63 }
  0xca   : > { %v607_v4 = vsel %vm242_vm0, %v598_v2, 0  ;;  %1684 = vmatmul.msk.bf16.vlgmr.msrb.gmra.mxu2 %vm238_vm1, %v1681_v56 }
  0xcb   : > { %632 = vmatpush.bf16.msra.mxu0 %v607_v4 }
  0xcd   : > { %v826_v5 = vpop.permute.xlu2 %825 }
  0xce   : > { %v596_v6 = vpop.permute.xlu1 %595 }
  0xcf   : > { %718 = vmatpush.bf16.msrb.mxu0 %v683_v3  ;;  %v599_v9 = vsel %vm234_vm3, %v594_v1, %v596_v6 }
  0xd0   : > { %v610_v11 = vsel %vm242_vm0, %v599_v9, 0  ;;  %v745_v12 = vpop.permute.xlu0 %744 }
  0xd1   : > { %v750_v7 = vsel %vm748_vm6, %v743_v49, %v745_v12  ;;  %645 = vmatpush.bf16.msra.mxu1 %v610_v11 }
  0xd2   : > { %v759_v13 = vsel %vm242_vm0, %v750_v7, 0  ;;  %1690 = vmatmul.msk.bf16.vlgmr.msra.gmra.mxu3 %vm238_vm1, %v1688_v10 }
  0xd3   : > { %784 = vmatpush.bf16.msrb.mxu2 %v759_v13 }
  0xd5   : > { %v820_v14 = vpop.permute.xlu2 %819 }
  0xd6   : > { %v747_v15 = vpop.permute.xlu1 %746 }
  0xd7   : > { %v751_v16 = vsel %vm748_vm6, %v745_v12, %v747_v15 }
  0xd8   : > { %v762_v8 = vsel %vm242_vm0, %v751_v16, 0  ;;  %v741_v17 = vpop.permute.xlu0 %740  ;;  %1686 = vmatmul.msk.bf16.vlgmr.msra.gmra.mxu0 %vm238_vm1, %v1680_v52  ;;  %1687 = vmatmul.msk.bf16.vlgmr.msra.gmra.mxu1 %vm238_vm1, %v1680_v52 }
  0xd9   : > { %v749_v18 = vsel %vm748_vm6, %v741_v17, %v743_v49  ;;  %797 = vmatpush.bf16.msrb.mxu3 %v762_v8 }
  0xda   : > { %v756_v19 = vsel %vm242_vm0, %v749_v18, 0  ;;  %1689 = vmatmul.msk.bf16.vlgmr.msra.gmra.mxu2 %vm238_vm1, %v1688_v10 }
  0xdb   : > { %771 = vmatpush.bf16.msrb.mxu1 %v756_v19 }
  0xdd   : > { %v968_v20 = vpop.permute.xlu2 %967 }
  0xde   : > { %v824_v21 = vpop.permute.xlu1 %823 }
  0xdf   : > { %v829_v0 = vsel %vm444_vm4, %v824_v21, %v826_v5 }
  0xe0   : > { %v840_v23 = vsel %vm242_vm0, %v829_v0, 0  ;;  %v891_v24 = vpop.permute.xlu0 %890 }
  0xe1   : > { %875 = vmatpush.bf16.msra.mxu2 %v840_v23 }
  0xe2   : > { %1695 = vmatmul.msk.bf16.vlgmr.msrb.gmra.mxu3 %vm238_vm1, %v1692_v22 }
  0xe5   : > { %v897_v25 = vpop.permute.xlu2 %896 }
  0xe6   : > { %v893_v26 = vpop.permute.xlu1 %892 }
  0xe7   : > { %v898_v27 = vsel %vm365_vm2, %v891_v24, %v893_v26 }
  0xe8   : > { %v905_v28 = vsel %vm242_vm0, %v898_v27, 0  ;;  %v822_v29 = vpop.permute.xlu0 %821  ;;  %1691 = vmatmul.msk.bf16.vlgmr.msrb.gmra.mxu0 %vm238_vm1, %v1688_v10  ;;  %1693 = vmatmul.msk.bf16.vlgmr.msrb.gmra.mxu1 %vm238_vm1, %v1692_v22  ;;  %v1708_v10 = vld [vmem:[%s2267_s1 + $0x2c] sm:$0xf] }
  0xe9   : > { %v827_v30 = vsel %vm444_vm4, %v820_v14, %v822_v29  ;;  %v828_v31 = vsel %vm444_vm4, %v822_v29, %v824_v21  ;;  %920 = vmatpush.bf16.msra.mxu3 %v905_v28  ;;  %v1712_v28 = vld [vmem:[%s2267_s1 + $0x30] sm:$0xf] }
  0xea   : > { %v834_v32 = vsel %vm242_vm0, %v827_v30, 0  ;;  %v837_v33 = vsel %vm242_vm0, %v828_v31, 0  ;;  %1694 = vmatmul.msk.bf16.vlgmr.msrb.gmra.mxu2 %vm238_vm1, %v1692_v22 }
  0xeb   : > { %862 = vmatpush.bf16.msra.mxu1 %v837_v33  ;;  %849 = vmatpush.bf16.msra.mxu0 %v834_v32 }
  0xed   : > { %v1051_v34 = vpop.permute.xlu2 %1050 }
  0xee   : > { %v966_v35 = vpop.permute.xlu1 %965 }
  0xef   : > { %v974_v36 = vsel %vm973_vm7, %v966_v35, %v968_v20 }
  0xf0   : > { %v970_v38 = vpop.permute.xlu0 %969  ;;  %v981_v39 = vsel %vm242_vm0, %v974_v36, 0 }
  0xf1   : > { %v975_v40 = vsel %vm973_vm7, %v968_v20, %v970_v38  ;;  %996 = vmatpush.bf16.msrb.mxu2 %v981_v39 }
  0xf2   : > { %v984_v41 = vsel %vm242_vm0, %v975_v40, 0  ;;  %1701 = vmatmul.msk.bf16.vlgmr.msra.gmra.mxu3 %vm238_vm1, %v1696_v37 }
  0xf3   : > { %1009 = vmatpush.bf16.msrb.mxu3 %v984_v41 }
  0xf5   : > { %v1128_v43 = vpop.permute.xlu2 %1127 }
  0xf6   : > { %v895_v44 = vpop.permute.xlu1 %894 }
  0xf7   : > { %v899_v45 = vsel %vm365_vm2, %v893_v26, %v895_v44  ;;  %v900_v46 = vsel %vm365_vm2, %v895_v44, %v897_v25 }
  0xf8   : > { %v908_v47 = vsel %vm242_vm0, %v899_v45, 0  ;;  %v911_v48 = vsel %vm242_vm0, %v900_v46, 0  ;;  %v1047_v49 = vpop.permute.xlu0 %1046  ;;  %1698 = vmatmul.msk.bf16.vlgmr.msra.gmra.mxu0 %vm238_vm1, %v1697_v42  ;;  %1699 = vmatmul.msk.bf16.vlgmr.msra.gmra.mxu1 %vm238_vm1, %v1697_v42 }
  0xf9   : > { %933 = vmatpush.bf16.msrb.mxu0 %v908_v47  ;;  %946 = vmatpush.bf16.msrb.mxu1 %v911_v48 }
  0xfa   : > { %1700 = vmatmul.msk.bf16.vlgmr.msra.gmra.mxu2 %vm238_vm1, %v1697_v42 }
  0xfd   : > { %v1197_v51 = vpop.permute.xlu2 %1196 }
  0xfe   : > { %v1049_v52 = vpop.permute.xlu1 %1048 }
  0xff   : > { %v1054_v53 = vsel %vm1052_vm8, %v1047_v49, %v1049_v52  ;;  %v1055_v54 = vsel %vm1052_vm8, %v1049_v52, %v1051_v34 }
 0x100   : > { %v1063_v56 = vsel %vm242_vm0, %v1054_v53, 0  ;;  %v1066_v57 = vsel %vm242_vm0, %v1055_v54, 0  ;;  %v972_v58 = vpop.permute.xlu0 %971 }
 0x101   : > { %v976_v59 = vsel %vm973_vm7, %v970_v38, %v972_v58  ;;  %1088 = vmatpush.bf16.msra.mxu2 %v1063_v56  ;;  %1101 = vmatpush.bf16.msra.mxu3 %v1066_v57  ;;  %v1713_v38 = vld [vmem:[%s2267_s1 + $0x34] sm:$0xf] }
 0x102   : > { %v987_v60 = vsel %vm242_vm0, %v976_v59, 0  ;;  %1706 = vmatmul.msk.bf16.vlgmr.msrb.gmra.mxu3 %vm238_vm1, %v1704_v55 }
 0x103   : > { %1022 = vmatpush.bf16.msra.mxu0 %v987_v60 }
 0x105   : > { %v1268_v1 = vpop.permute.xlu2 %1267 }
 0x106   : > { %v1045_v62 = vpop.permute.xlu1 %1044 }
 0x107   : > { %v1053_v63 = vsel %vm1052_vm8, %v1045_v62, %v1047_v49 }
 0x108   : > { %v1060_v2 = vsel %vm242_vm0, %v1053_v63, 0  ;;  %1702 = vmatmul.msk.bf16.vlgmr.msrb.gmra.mxu0 %vm238_vm1, %v1696_v37  ;;  %1703 = vmatmul.msk.bf16.vlgmr.msrb.gmra.mxu1 %vm238_vm1, %v1696_v37  ;;  %v1130_v3 = vpop.permute.xlu0 %1129 }
 0x109   : > { %1075 = vmatpush.bf16.msra.mxu1 %v1060_v2  ;;  %v1133_v4 = vsel %vm748_vm6, %v1128_v43, %v1130_v3 }
 0x10a   : > { %1705 = vmatmul.msk.bf16.vlgmr.msrb.gmra.mxu2 %vm238_vm1, %v1704_v55  ;;  %v1144_v5 = vsel %vm242_vm0, %v1133_v4, 0 }
 0x10b   : > { %1179 = vmatpush.bf16.msrb.mxu2 %v1144_v5 }
 0x10d   : > { %v1199_v7 = vpop.permute.xlu2 %1198 }
 0x10e   : > { %v1195_v6 = vpop.permute.xlu1 %1194  ;;  %v1203_v13 = vsel %vm444_vm4, %v1197_v51, %v1199_v7 }
 0x10f   : > { %v1202_v9 = vsel %vm444_vm4, %v1195_v6, %v1197_v51  ;;  %v1212_v18 = vsel %vm242_vm0, %v1203_v13, 0 }
 0x110   : > { %v1209_v11 = vsel %vm242_vm0, %v1202_v9, 0  ;;  %v1124_v12 = vpop.permute.xlu0 %1123 }
 0x111   : > { %1224 = vmatpush.bf16.msrb.mxu3 %v1209_v11 }
 0x112   : > { %1711 = vmatmul.msk.bf16.vlgmr.msra.gmra.mxu3 %vm238_vm1, %v1708_v10 }
 0x115   : > { %v2087_v14 = vpop.f32.mrf.mxu0  ;;  %v2089_v15 = vpop.f32.mrf.mxu1 }
 0x116   : > { %v1126_v16 = vpop.permute.xlu1 %1125  ;;  %v1350_v23 = vpop.permute.xlu2 %1349  ;;  %v315_v61 = vadd.f32 %v2061_v50, %v2087_v14 }
 0x117   : > { %v1132_v8 = vsel %vm748_vm6, %v1126_v16, %v1128_v43  ;;  %v1131_v17 = vsel %vm748_vm6, %v1124_v12, %v1126_v16 }
 0x118   : > { %v1141_v19 = vsel %vm242_vm0, %v1132_v8, 0  ;;  %1707 = vmatmul.msk.bf16.vlgmr.msra.gmra.mxu0 %vm238_vm1, %v1704_v55  ;;  %1709 = vmatmul.msk.bf16.vlgmr.msra.gmra.mxu1 %vm238_vm1, %v1708_v10  ;;  %v1138_v20 = vsel %vm242_vm0, %v1131_v17, 0  ;;  %v1270_v21 = vpop.permute.xlu0 %1269  ;;  %v1720_v55 = vld [vmem:[%s2267_s1 + $0x38] sm:$0xf] }
 0x119   : > { %1166 = vmatpush.bf16.msrb.mxu1 %v1141_v19  ;;  %1153 = vmatpush.bf16.msrb.mxu0 %v1138_v20  ;;  %v1275_v0 = vsel %vm1052_vm8, %v1268_v1, %v1270_v21  ;;  %v1411_v1 = vld [vmem:[%s2268_s2] sm:$0x7] }
 0x11a   : > { %1710 = vmatmul.msk.bf16.vlgmr.msra.gmra.mxu2 %vm238_vm1, %v1708_v10  ;;  %v1282_v22 = vsel %vm242_vm0, %v1275_v0, 0  ;;  %v2135_v6 = vperm.slane %v1411_v1, 0  ;;  %v2137_v50 = vperm.slane %v1411_v1, 1  ;;  %v2141_v12 = vperm.slane %v1411_v1, 2 }
 0x11b   : > { %1297 = vmatpush.bf16.msra.mxu2 %v1282_v22 }
 0x11c   : > { %v287_v24 = vpop.f32.mrf.mxu2 }
 0x11d   : > { %1237 = vmatpush.bf16.msra.mxu0 %v1212_v18  ;;  %v263_v25 = vpop.f32.mrf.mxu0  ;;  %v276_v26 = vpop.f32.mrf.mxu1 }
 0x11e   : > { %v1272_v27 = vpop.permute.xlu1 %1271  ;;  %v1346_v35 = vpop.permute.xlu2 %1345 }
 0x11f   : > { %v1276_v29 = vsel %vm1052_vm8, %v1270_v21, %v1272_v27 }
 0x120   : > { %v1285_v30 = vsel %vm242_vm0, %v1276_v29, 0  ;;  %v1201_v31 = vpop.permute.xlu0 %1200 }
 0x121   : > { %1310 = vmatpush.bf16.msra.mxu3 %v1285_v30  ;;  %v1204_v32 = vsel %vm444_vm4, %v1199_v7, %v1201_v31 }
 0x122   : > { %1717 = vmatmul.msk.bf16.vlgmr.msrb.gmra.mxu3 %vm238_vm1, %v1712_v28  ;;  %v1215_v33 = vsel %vm242_vm0, %v1204_v32, 0 }
 0x123   : > { %1250 = vmatpush.bf16.msra.mxu1 %v1215_v33 }
 0x124   : > { %v289_v34 = vpop.f32.mrf.mxu2 }
 0x125   : > { %v327_v36 = vpop.f32.mrf.mxu0  ;;  %v340_v37 = vpop.f32.mrf.mxu1 }
 0x126   : > { %v1348_v39 = vpop.permute.xlu1 %1347  ;;  %v403_v40 = vpop.f32.mrf.mxu3  ;;  %v328_v62 = vadd.f32 %v327_v36, %v2089_v15  ;;  %v341_v63 = vadd.f32 %v340_v37, %v287_v24  ;;  %v1724_v15 = vld [vmem:[%s2267_s1 + $0x3c] sm:$0xf] }
 0x127   : > { %v1355_v41 = vsel %vm1353_vm9, %v1348_v39, %v1350_v23  ;;  %v1354_v42 = vsel %vm1353_vm9, %v1346_v35, %v1348_v39 }
 0x128   : > { %1714 = vmatmul.msk.bf16.vlgmr.msrb.gmra.mxu0 %vm238_vm1, %v1713_v38  ;;  %1715 = vmatmul.msk.bf16.vlgmr.msrb.gmra.mxu1 %vm238_vm1, %v1713_v38  ;;  %v1364_v43 = vsel %vm242_vm0, %v1355_v41, 0  ;;  %v1352_v44 = vpop.permute.xlu0 %1351  ;;  %v1361_v45 = vsel %vm242_vm0, %v1354_v42, 0  ;;  %v421_v4 = vadd.f32 %v403_v40, %v328_v62 }
 0x129   : > { %v1356_v46 = vsel %vm1353_vm9, %v1350_v23, %v1352_v44  ;;  %1376 = vmatpush.bf16.msrb.mxu1 %v1361_v45 }
 0x12a   : > { %1716 = vmatmul.msk.bf16.vlgmr.msrb.gmra.mxu2 %vm238_vm1, %v1713_v38  ;;  %v1367_v47 = vsel %vm242_vm0, %v1356_v46, 0 }
 0x12b   : > { %1389 = vmatpush.bf16.msrb.mxu2 %v1364_v43  ;;  %1402 = vmatpush.bf16.msrb.mxu3 %v1367_v47 }
 0x12c   : > { %v390_v48 = vpop.f32.mrf.mxu2 }
 0x12d   : > { %v329_v49 = vpop.f32.mrf.mxu0  ;;  %v342_v51 = vpop.f32.mrf.mxu1  ;;  %v420_v2 = vadd.f32 %v390_v48, %v315_v61 }
 0x12e   : > { %v1274_v52 = vpop.permute.xlu1 %1273  ;;  %v405_v53 = vpop.f32.mrf.mxu3 }
 0x12f   : > { %v1277_v54 = vsel %vm1052_vm8, %v1272_v27, %v1274_v52 }
 0x130   : > { %v1288_v56 = vsel %vm242_vm0, %v1277_v54, 0 }
 0x131   : > { %1323 = vmatpush.bf16.msrb.mxu0 %v1288_v56 }
 0x132   : > { %1722 = vmatmul.msk.bf16.vlgmr.msra.gmra.mxu3 %vm238_vm1, %v1720_v55 }
 0x134   : > { %v392_v57 = vpop.f32.mrf.mxu2 }
 0x135   : > { %v416_v58 = vpop.f32.mrf.mxu0  ;;  %v469_v59 = vpop.f32.mrf.mxu1 }
 0x136   : > { %v495_v60 = vpop.f32.mrf.mxu3  ;;  %v422_v3 = vadd.f32 %v416_v58, %v341_v63  ;;  %v2133_v5 = vadd.f32 %v469_v59, %v420_v2 }
 0x138   : > { %1718 = vmatmul.msk.bf16.vlgmr.msra.gmra.mxu0 %vm238_vm1, %v1712_v28  ;;  %1719 = vmatmul.msk.bf16.vlgmr.msra.gmra.mxu1 %vm238_vm1, %v1712_v28  ;;  %v2139_v11 = vadd.f32 %v495_v60, %v422_v3  ;;  %v1419_v16 = vmul.f32 %v2135_v6, %v2133_v5 }
 0x13a   : > { %1721 = vmatmul.msk.bf16.vlgmr.msra.gmra.mxu2 %vm238_vm1, %v1720_v55  ;;  %v1421_v17 = vmul.f32 %v2141_v12, %v2139_v11 }
 0x13d   : > { %v482_v9 = vpop.f32.mrf.mxu2  ;;  %v418_v10 = vpop.f32.mrf.mxu0 }
 0x13e   : > { %v2143_v7 = vadd.f32 %v482_v9, %v421_v4  ;;  %v471_v13 = vpop.f32.mrf.mxu1  ;;  %v497_v14 = vpop.f32.mrf.mxu3 }
 0x140   : > { %v1420_v8 = vmul.f32 %v2137_v50, %v2143_v7 }
 0x142   : > { %1727 = vmatmul.msk.bf16.vlgmr.msrb.gmra.mxu3 %vm238_vm1, %v1724_v15  ;;  %v1422_v18 = vadd.f32 %v1420_v8, %v1419_v16 }
 0x144   : > { %v1423_v19 = vadd.f32 %v1422_v18, %v1421_v17 }
 0x145   : > { %v484_v20 = vpop.f32.mrf.mxu2  ;;  %v550_v21 = vpop.f32.mrf.mxu0 }
 0x146   : > { %1424 = vadd.xlane.f32.xlu0 %v1423_v19  ;;  %v563_v0 = vpop.f32.mrf.mxu1  ;;  %v621_v22 = vpop.f32.mrf.mxu3 }
 0x147   : > { %v622_v39 = vadd.f32 %v621_v22, %v550_v21 }
 0x148   : > { %1723 = vmatmul.msk.bf16.vlgmr.msrb.gmra.mxu0 %vm238_vm1, %v1720_v55  ;;  %1725 = vmatmul.msk.bf16.vlgmr.msrb.gmra.mxu1 %vm238_vm1, %v1724_v15 }
 0x14a   : > { %1726 = vmatmul.msk.bf16.vlgmr.msrb.gmra.mxu2 %vm238_vm1, %v1724_v15 }
 0x14d   : > { %v576_v23 = vpop.f32.mrf.mxu2  ;;  %v552_v24 = vpop.f32.mrf.mxu0 }
 0x14e   : > { %v565_v25 = vpop.f32.mrf.mxu1  ;;  %v623_v26 = vpop.f32.mrf.mxu3 }
 0x155   : > { %v578_v27 = vpop.f32.mrf.mxu2  ;;  %v634_v28 = vpop.f32.mrf.mxu0 }
 0x156   : > { %v647_v29 = vpop.f32.mrf.mxu1  ;;  %v707_v30 = vpop.f32.mrf.mxu3  ;;  %v635_v40 = vadd.f32 %v634_v28, %v563_v0 }
 0x157   : > { %v648_v41 = vadd.f32 %v647_v29, %v576_v23 }
 0x158   : > { %v725_v44 = vadd.f32 %v707_v30, %v635_v40 }
 0x15d   : > { %v694_v31 = vpop.f32.mrf.mxu2  ;;  %v636_v32 = vpop.f32.mrf.mxu0 }
 0x15e   : > { %v649_v33 = vpop.f32.mrf.mxu1  ;;  %v709_v34 = vpop.f32.mrf.mxu3  ;;  %v724_v42 = vadd.f32 %v694_v31, %v622_v39 }
 0x165   : > { %v696_v35 = vpop.f32.mrf.mxu2  ;;  %v720_v36 = vpop.f32.mrf.mxu0 }
 0x166   : > { %v773_v37 = vpop.f32.mrf.mxu1  ;;  %v799_v38 = vpop.f32.mrf.mxu3  ;;  %v726_v43 = vadd.f32 %v720_v36, %v648_v41 }
 0x167   : > { %v2158_v45 = vadd.f32 %v773_v37, %v724_v42 }
 0x168   : > { %v2160_v48 = vadd.f32 %v799_v38, %v726_v43 }
 0x169   : > { %v1426_v53 = vmul.f32 %v2135_v6, %v2158_v45 }
 0x16a   : > { %v1428_v55 = vmul.f32 %v2141_v12, %v2160_v48 }
 0x16d   : > { %v786_v46 = vpop.f32.mrf.mxu2  ;;  %v722_v47 = vpop.f32.mrf.mxu0 }
 0x16e   : > { %v2162_v49 = vadd.f32 %v786_v46, %v725_v44  ;;  %v775_v51 = vpop.f32.mrf.mxu1  ;;  %v801_v52 = vpop.f32.mrf.mxu3 }
 0x170   : > { %v1427_v54 = vmul.f32 %v2137_v50, %v2162_v49 }
 0x172   : > { %v1429_v56 = vadd.f32 %v1427_v54, %v1426_v53 }
 0x174   : > { %v1430_v57 = vadd.f32 %v1429_v56, %v1428_v55 }
 0x175   : > { %v788_v58 = vpop.f32.mrf.mxu2  ;;  %v851_v59 = vpop.f32.mrf.mxu0 }
 0x176   : > { %1431 = vadd.xlane.f32.xlu1 %v1430_v57  ;;  %v864_v60 = vpop.f32.mrf.mxu1  ;;  %v922_v61 = vpop.f32.mrf.mxu3 }
 0x177   : > { %v923_v20 = vadd.f32 %v922_v61, %v851_v59 }
 0x17d   : > { %v877_v62 = vpop.f32.mrf.mxu2  ;;  %v853_v63 = vpop.f32.mrf.mxu0 }
 0x17e   : > { %v866_v1 = vpop.f32.mrf.mxu1  ;;  %v924_v2 = vpop.f32.mrf.mxu3 }
 0x185   : > { %v879_v3 = vpop.f32.mrf.mxu2  ;;  %v935_v4 = vpop.f32.mrf.mxu0 }
 0x186   : > { %v948_v9 = vpop.f32.mrf.mxu1  ;;  %v1011_v10 = vpop.f32.mrf.mxu3  ;;  %v936_v21 = vadd.f32 %v935_v4, %v864_v60 }
 0x187   : > { %v949_v0 = vadd.f32 %v948_v9, %v877_v62 }
 0x188   : > { %v1029_v24 = vadd.f32 %v1011_v10, %v936_v21 }
 0x18d   : > { %v998_v13 = vpop.f32.mrf.mxu2  ;;  %v937_v14 = vpop.f32.mrf.mxu0 }
 0x18e   : > { %v950_v15 = vpop.f32.mrf.mxu1  ;;  %v1013_v16 = vpop.f32.mrf.mxu3  ;;  %v1028_v22 = vadd.f32 %v998_v13, %v923_v20 }
 0x195   : > { %v1000_v8 = vpop.f32.mrf.mxu2  ;;  %v1024_v17 = vpop.f32.mrf.mxu0 }
 0x196   : > { %v1077_v18 = vpop.f32.mrf.mxu1  ;;  %v1103_v19 = vpop.f32.mrf.mxu3  ;;  %v1030_v23 = vadd.f32 %v1024_v17, %v949_v0 }
 0x197   : > { %v1107_v25 = vadd.f32 %v1077_v18, %v1028_v22 }
 0x198   : > { %v1109_v28 = vadd.f32 %v1103_v19, %v1030_v23 }
 0x199   : > { %v1434_v32 = vmul.f32 %v2135_v6, %v1107_v25 }
 0x19a   : > { %v1436_v34 = vmul.f32 %v2141_v12, %v1109_v28 }
 0x19d   : > { %v1090_v26 = vpop.f32.mrf.mxu2  ;;  %v1026_v27 = vpop.f32.mrf.mxu0 }
 0x19e   : > { %v1108_v29 = vadd.f32 %v1090_v26, %v1029_v24  ;;  %v1079_v30 = vpop.f32.mrf.mxu1  ;;  %v1105_v31 = vpop.f32.mrf.mxu3 }
 0x1a0   : > { %v1435_v33 = vmul.f32 %v2137_v50, %v1108_v29 }
 0x1a2   : > { %v1437_v35 = vadd.f32 %v1435_v33, %v1434_v32 }
 0x1a4   : > { %v1438_v36 = vadd.f32 %v1437_v35, %v1436_v34 }
 0x1a5   : > { %v1092_v37 = vpop.f32.mrf.mxu2  ;;  %v1155_v38 = vpop.f32.mrf.mxu0 }
 0x1a6   : > { %1439 = vadd.xlane.f32.xlu2 %v1438_v36  ;;  %v1168_v39 = vpop.f32.mrf.mxu1  ;;  %v1226_v40 = vpop.f32.mrf.mxu3 }
 0x1a7   : > { %v1227_v61 = vadd.f32 %v1226_v40, %v1155_v38 }
 0x1ad   : > { %v1181_v41 = vpop.f32.mrf.mxu2  ;;  %v1157_v42 = vpop.f32.mrf.mxu0 }
 0x1ae   : > { %v1170_v43 = vpop.f32.mrf.mxu1  ;;  %v1228_v44 = vpop.f32.mrf.mxu3 }
 0x1b5   : > { %v1183_v46 = vpop.f32.mrf.mxu2  ;;  %v1239_v47 = vpop.f32.mrf.mxu0 }
 0x1b6   : > { %v1252_v51 = vpop.f32.mrf.mxu1  ;;  %v1312_v52 = vpop.f32.mrf.mxu3  ;;  %v1240_v62 = vadd.f32 %v1239_v47, %v1168_v39 }
 0x1b7   : > { %v1253_v63 = vadd.f32 %v1252_v51, %v1181_v41 }
 0x1b8   : > { %v1330_v3 = vadd.f32 %v1312_v52, %v1240_v62 }
 0x1b9   : > { %v1425_v23 = vpop.xlane.xlu0 %1424 }
 0x1bd   : > { %v1299_v53 = vpop.f32.mrf.mxu2  ;;  %v1241_v54 = vpop.f32.mrf.mxu0 }
 0x1be   : > { %v1254_v55 = vpop.f32.mrf.mxu1  ;;  %v1314_v56 = vpop.f32.mrf.mxu3  ;;  %v1329_v1 = vadd.f32 %v1299_v53, %v1227_v61 }
 0x1c5   : > { %v1301_v57 = vpop.f32.mrf.mxu2  ;;  %v1325_v58 = vpop.f32.mrf.mxu0 }
 0x1c6   : > { %v1378_v59 = vpop.f32.mrf.mxu1  ;;  %v1404_v60 = vpop.f32.mrf.mxu3  ;;  %v1331_v2 = vadd.f32 %v1325_v58, %v1253_v63 }
 0x1c7   : > { %v1408_v4 = vadd.f32 %v1378_v59, %v1329_v1 }
 0x1c8   : > { %v1410_v13 = vadd.f32 %v1404_v60, %v1331_v2 }
 0x1c9   : > { %v1442_v8 = vmul.f32 %v2135_v6, %v1408_v4 }
 0x1ca   : > { %v1444_v18 = vmul.f32 %v2141_v12, %v1410_v13 }
 0x1cd   : > { %v1391_v9 = vpop.f32.mrf.mxu2  ;;  %v1327_v10 = vpop.f32.mrf.mxu0 }
 0x1ce   : > { %v1409_v14 = vadd.f32 %v1391_v9, %v1330_v3  ;;  %v1380_v15 = vpop.f32.mrf.mxu1  ;;  %v1406_v16 = vpop.f32.mrf.mxu3 }
 0x1d0   : > { %v1443_v17 = vmul.f32 %v2137_v50, %v1409_v14 }
 0x1d2   : > { %v1445_v19 = vadd.f32 %v1443_v17, %v1442_v8 }
 0x1d4   : > { %v1446_v20 = vadd.f32 %v1445_v19, %v1444_v18 }
 0x1d5   : > { %v1393_v21 = vpop.f32.mrf.mxu2 }
 0x1d6   : > { %1447 = vadd.xlane.f32.xlu2 %v1446_v20 }
 0x1e9   : > { %v1432_v22 = vpop.xlane.xlu1 %1431 }
 0x1ea   : > { %v1433_v24 = vadd.f32 %v1432_v22, %v1425_v23 }
 0x219   : > { %v1440_v0 = vpop.xlane.xlu2 %1439 }
 0x21a   : > { %v1441_v26 = vadd.f32 %v1440_v0, %v1433_v24 }
 0x249   : > { %v1448_v27 = vpop.xlane.xlu2 %1447 }
 0x24a   : > { %v1449_v30 = vadd.f32 %v1448_v27, %v1441_v26 }
 0x24c   : > { %v1450_v31 = vmul.f32 0.0009765625, %v1449_v30 }
 0x24e   : > { %v2176_v32 = vsub.f32 %v1107_v25, %v1450_v31  ;;  %v2178_v33 = vsub.f32 %v1108_v29, %v1450_v31  ;;  %v2180_v34 = vsub.f32 %v1109_v28, %v1450_v31  ;;  %v2183_v35 = vsub.f32 %v2158_v45, %v1450_v31 }
 0x24f   : > { %v2186_v36 = vsub.f32 %v2162_v49, %v1450_v31  ;;  %v2189_v37 = vsub.f32 %v2160_v48, %v1450_v31  ;;  %v2192_v38 = vsub.f32 %v2133_v5, %v1450_v31  ;;  %v2195_v39 = vsub.f32 %v2143_v7, %v1450_v31 }
 0x250   : > { %v1481_v25 = vmul.f32 %v2176_v32, %v2176_v32  ;;  %v1482_v28 = vmul.f32 %v2178_v33, %v2178_v33  ;;  %v1483_v45 = vmul.f32 %v2180_v34, %v2180_v34  ;;  %v1467_v49 = vmul.f32 %v2183_v35, %v2183_v35 }
 0x251   : > { %v1468_v48 = vmul.f32 %v2186_v36, %v2186_v36  ;;  %v1469_v5 = vmul.f32 %v2189_v37, %v2189_v37  ;;  %v1453_v7 = vsub.f32 %v2139_v11, %v1450_v31  ;;  %v1454_v29 = vmul.f32 %v2192_v38, %v2192_v38 }
 0x252   : > { %v1484_v40 = vmul.f32 %v1481_v25, %v2135_v6  ;;  %v1485_v41 = vmul.f32 %v1482_v28, %v2137_v50  ;;  %v1470_v42 = vmul.f32 %v1467_v49, %v2135_v6  ;;  %v1486_v43 = vmul.f32 %v1483_v45, %v2141_v12 }
 0x253   : > { %v1471_v44 = vmul.f32 %v1468_v48, %v2137_v50  ;;  %v1455_v46 = vmul.f32 %v2195_v39, %v2195_v39  ;;  %v1456_v47 = vmul.f32 %v1453_v7, %v1453_v7  ;;  %v1457_v11 = vmul.f32 %v1454_v29, %v2135_v6 }
 0x254   : > { %v1487_v51 = vadd.f32 %v1485_v41, %v1484_v40  ;;  %v1492_v52 = vsub.f32 %v1408_v4, %v1450_v31  ;;  %v2220_v53 = vsub.f32 %v1409_v14, %v1450_v31  ;;  %v1472_v54 = vmul.f32 %v1469_v5, %v2141_v12 }
 0x255   : > { %v1473_v55 = vadd.f32 %v1471_v44, %v1470_v42  ;;  %v1458_v56 = vmul.f32 %v1455_v46, %v2137_v50  ;;  %v1459_v61 = vmul.f32 %v1456_v47, %v2141_v12  ;;  %v1494_v63 = vsub.f32 %v1410_v13, %v1450_v31 }
 0x256   : > { %v1488_v57 = vadd.f32 %v1487_v51, %v1486_v43  ;;  %v1495_v58 = vmul.f32 %v1492_v52, %v1492_v52  ;;  %v1496_v59 = vmul.f32 %v2220_v53, %v2220_v53 }
 0x257   : > { %v1474_v60 = vadd.f32 %v1473_v55, %v1472_v54  ;;  %v1460_v62 = vadd.f32 %v1458_v56, %v1457_v11  ;;  %v1497_v4 = vmul.f32 %v1494_v63, %v1494_v63 }
 0x258   : > { %1489 = vadd.xlane.f32.xlu2 %v1488_v57  ;;  %v1498_v2 = vmul.f32 %v1495_v58, %v2135_v6  ;;  %v1499_v3 = vmul.f32 %v1496_v59, %v2137_v50 }
 0x259   : > { %1475 = vadd.xlane.f32.xlu1 %v1474_v60  ;;  %v1461_v1 = vadd.f32 %v1460_v62, %v1459_v61  ;;  %v1500_v10 = vmul.f32 %v1497_v4, %v2141_v12 }
 0x25a   : > { %v1501_v9 = vadd.f32 %v1499_v3, %v1498_v2 }
 0x25b   : > { %1462 = vadd.xlane.f32.xlu0 %v1461_v1 }
 0x25c   : > { %v1502_v14 = vadd.f32 %v1501_v9, %v1500_v10 }
 0x263   : > { %1503 = vadd.xlane.f32.xlu0 %v1502_v14 }
 0x2cb   : > { %v1490_v17 = vpop.xlane.xlu2 %1489 }
 0x2cc   : > { %v1476_v15 = vpop.xlane.xlu1 %1475 }
 0x2ce   : > { %v1463_v16 = vpop.xlane.xlu0 %1462 }
 0x2cf   : > { %v1477_v8 = vadd.f32 %v1476_v15, %v1463_v16 }
 0x2d1   : > { %v1491_v13 = vadd.f32 %v1490_v17, %v1477_v8 }
 0x2d6   : > { %v1504_v18 = vpop.xlane.xlu0 %1503 }
 0x2d7   : > { %v1505_v19 = vadd.f32 %v1504_v18, %v1491_v13 }
 0x2d9   : > { %v1506_v20 = vmul.f32 0.0009765625, %v1505_v19 }
 0x2db   : > { %v1507_v21 = vadd.f32 1e-05, %v1506_v20 }
 0x2dd   : > { %1773 = vrsqrt.f32 %v1507_v21  ;;  %vm1514_vm11 = vweird.f32 %v1507_v21 }
 0x2e3   : > { %v1774_v6 = vpop.eup %1773 }
 0x2e4   : > { %v1509_v50 = vmul.f32 %v1774_v6, %v1507_v21  ;;  %vm1515_vm10 = vweird.f32 %v1774_v6 }
 0x2e5   : > { %vm1516_vm12 = vmor %vm1514_vm11, %vm1515_vm10 }
 0x2e6   : > { %v1510_v0 = vmul.f32 %v1774_v6, %v1509_v50 }
 0x2e8   : > { %v1511_v22 = vmul.f32 0.5, %v1510_v0 }
 0x2ea   : > { %v1512_v23 = vsub.f32 1.5, %v1511_v22 }
 0x2ec   : > { %v1513_v12 = vmul.f32 %v1774_v6, %v1512_v23 }
 0x2ee   : > { %v1517_v24 = vsel %vm1516_vm12, %v1774_v6, %v1513_v12 }
 0x2ef   : > { %v1518_v26 = vmul.f32 %v1517_v24, %v2192_v38  ;;  %v1519_v27 = vmul.f32 %v1517_v24, %v2195_v39  ;;  %v1520_v30 = vmul.f32 %v1517_v24, %v1453_v7  ;;  %v1527_v31 = vmul.f32 %v1517_v24, %v2183_v35 }
 0x2f0   : > { %v1528_v25 = vmul.f32 %v1517_v24, %v2186_v36  ;;  %v1529_v28 = vmul.f32 %v1517_v24, %v2189_v37  ;;  %v1537_v39 = vmul.f32 %v1517_v24, %v2176_v32  ;;  %v1538_v48 = vmul.f32 %v1517_v24, %v2178_v33 }
 0x2f1   : > { %v1521_v45 = vmax.f32 %v1518_v26, 0.0  ;;  %v1522_v38 = vmax.f32 %v1519_v27, 0.0  ;;  %v1523_v49 = vmax.f32 %v1520_v30, 0.0  ;;  %v1530_v35 = vmax.f32 %v1527_v31, 0.0 }
 0x2f2   : > { %v1531_v5 = vmax.f32 %v1528_v25, 0.0  ;;  %v1539_v7 = vmul.f32 %v1517_v24, %v2180_v34  ;;  %v1532_v36 = vmax.f32 %v1529_v28, 0.0  ;;  %v1547_v37 = vmul.f32 %v1517_v24, %v1492_v52 }
 0x2f3   : > { %1524 = vst [vmem:[%s2237_s19] sm:$0xff] %v1521_v45  ;;  %v1540_v29 = vmax.f32 %v1537_v39, 0.0  ;;  %v1548_v32 = vmul.f32 %v1517_v24, %v2220_v53  ;;  %v1541_v40 = vmax.f32 %v1538_v48, 0.0  ;;  %v1549_v33 = vmul.f32 %v1517_v24, %v1494_v63 }
 0x2f4   : > { %1525 = vst [vmem:[%s2237_s19 + $0x8] sm:$0xff] %v1522_v38  ;;  %v1542_v41 = vmax.f32 %v1539_v7, 0.0  ;;  %v1550_v42 = vmax.f32 %v1547_v37, 0.0 }
 0x2f5   : > { %1526 = vst [vmem:[%s2237_s19 + $0x10] sm:$0xff] %v1523_v49  ;;  %v1551_v34 = vmax.f32 %v1548_v32, 0.0  ;;  %v1552_v43 = vmax.f32 %v1549_v33, 0.0 }
 0x2f6   : > { %1728 = vst [vmem:[%s2237_s19 + $0x18] sm:$0xff] %v1530_v35 }
 0x2f7   : > { %1729 = vst [vmem:[%s2237_s19 + $0x20] sm:$0xff] %v1531_v5 }
 0x2f8   : > { %1730 = vst [vmem:[%s2237_s19 + $0x28] sm:$0xff] %v1532_v36 }
 0x2f9   : > { %1731 = vst [vmem:[%s2237_s19 + $0x30] sm:$0xff] %v1540_v29 }
 0x2fa   : > { %1732 = vst [vmem:[%s2237_s19 + $0x38] sm:$0xff] %v1541_v40 }
 0x2fb   : > { %1733 = vst [vmem:[%s2237_s19 + $0x40] sm:$0xff] %v1542_v41 }
 0x2fc   : > { %1734 = vst [vmem:[%s2237_s19 + $0x48] sm:$0xff] %v1550_v42 }
 0x2fd   : > { %1735 = vst [vmem:[%s2237_s19 + $0x50] sm:$0xff] %v1551_v34 }
 0x2fe   : > { %1736 = vst [vmem:[%s2237_s19 + $0x58] sm:$0xff] %v1552_v43 }
 0x2ff PF: > { %s13_s14 = sadd.s32 1, %s1797_s14   ;;  %s2270_s12 = smov %s1793_s13 }
 0x300   : > { %p10_p5 = scmp.ge.s32.totalorder %s13_s14, 4   ;;  %s2271_s13 = smov %s2273_s15 }
 0x302   :  { %12 = sbr.rel (!%p10_p5) target bundleno = 2 (0x2), region = 83 }

</bundles_post_ra>
